<compile_context>
chip_gen: v7x
topology: tpu7x:2x2x1
jax: 0.10.0
libtpu: 0.0.40
codegen_flags: <defaults>
</compile_context>

<pallas_src>
import functools

import jax
import jax.numpy as jnp
from jax import lax
from jax.experimental import pallas as pl
from jax.experimental.pallas import tpu as pltpu

_BOTTLENECK_EXPANSION = 4
_BN_EPS = 1e-5
_COMPUTE_DTYPE = jnp.bfloat16          # MXU input / output dtype (accumulation is f32)
_LANE = 128

_UNRESOLVED = object()
_WEIGHT_PIPELINE_MODE = _UNRESOLVED    # resolved (outside jit) by prepare_kernel_params


# --------------------------- small host-side helpers ---------------------------

def _round_up(v, m):
    return (v + m - 1) // m * m


def _vmem_limit_bytes():
    """Generation-aware scoped-VMEM limit (~82% of physical, capped at 104 MiB)."""
    try:
        cap = pltpu.get_tpu_info().vmem_capacity_bytes
    except Exception:
        cap = 64 * 1024 * 1024          # conservative fallback (v7x-sized)
    return min(int(cap * 0.82), 104 * 1024 * 1024)


def _resolve_weight_pipeline_mode():
    """Feature-detect pipeline_mode=pl.Buffered(1) for grid-invariant weight blocks.

    Weights/biases have constant index_maps, so default double buffering just doubles
    their VMEM footprint (w3 alone is 9*mid^2*2B).  Runs a tiny probe kernel, so it
    must be called OUTSIDE jit (prepare_kernel_params does).  If unsupported we fall
    back to default buffering.
    """
    global _WEIGHT_PIPELINE_MODE
    if _WEIGHT_PIPELINE_MODE is not _UNRESOLVED:
        return _WEIGHT_PIPELINE_MODE
    mode = None
    try:
        probe = pl.Buffered(1)

        def _probe_kernel(w_ref, x_ref, o_ref):
            o_ref[...] = x_ref[...] + w_ref[...]

        f = pl.pallas_call(
            _probe_kernel,
            out_shape=jax.ShapeDtypeStruct((16, 128), jnp.float32),
            grid=(2,),
            in_specs=[pl.BlockSpec((8, 128), lambda i: (0, 0), pipeline_mode=probe),
                      pl.BlockSpec((8, 128), lambda i: (i, 0))],
            out_specs=pl.BlockSpec((8, 128), lambda i: (i, 0)),
        )
        jax.block_until_ready(f(jnp.zeros((8, 128), jnp.float32),
                                jnp.ones((16, 128), jnp.float32)))
        mode = probe
    except Exception:
        mode = None
    _WEIGHT_PIPELINE_MODE = mode
    return mode


def _const_block_spec(shape):
    """BlockSpec for a grid-invariant operand (weight/bias), single-buffered if possible."""
    nd = len(shape)
    mode = _WEIGHT_PIPELINE_MODE if _WEIGHT_PIPELINE_MODE is not _UNRESOLVED else None
    if mode is None:
        return pl.BlockSpec(shape, lambda n: (0,) * nd)
    return pl.BlockSpec(shape, lambda n: (0,) * nd, pipeline_mode=mode)


# ------------------------------- fused kernel --------------------------------

def _bottleneck_kernel(x_ref, wr_ref, br_ref, w3_ref, b3_ref, wi_ref, bi_ref,
                       *rest, dil, Ho, Wo, has_shortcut):
    """reduce(1x1+BN+ReLU) -> dilated 3x3(+BN+ReLU) -> increase(1x1+BN) + shortcut -> ReLU.

    x_ref  : (Ho, Wo, Cin)                 strided NHWC input tile (f32)
    wr_ref : (Cin, midp)                   folded 1x1 reduce weight (bf16, mid padded to 128)
    w3_ref : (9*midp, midp)                folded 3x3 weight, tap-major rows (bf16)
    wi_ref : (midp, out_ch)                folded 1x1 increase weight (bf16)
    ws_ref : (Cin, out_ch)                 folded 1x1 shortcut weight (bf16, downsample only)
    b*_ref : (1, C)                        folded BN biases (f32)
    o_ref  : (Ho, Wo, out_ch)              output tile (bf16)
    h1p_ref: (Ho+2d, (Wo+2d)*midp)         VMEM scratch: zero-halo padded h1, lane-dense W*C
    pat_ref: (Ho*Wo, 9*midp)               VMEM scratch: im2col patch slab for one GEMM
    """
    if has_shortcut:
        ws_ref, bs_ref, o_ref, h1p_ref, pat_ref = rest
    else:
        o_ref, h1p_ref, pat_ref = rest

    cin = x_ref.shape[-1]
    midp = wr_ref.shape[-1]
    d = dil
    Hp = Ho + 2 * d
    Wm = (Wo + 2 * d) * midp

    x_f32 = x_ref[...].reshape(Ho * Wo, cin)                  # f32 rows x Cin
    x_bf = x_f32.astype(_COMPUTE_DTYPE)                       # bf16 copy for the MXU

    # ---- reduce: 1x1 conv (+ folded BN) + ReLU --------------------------------
    h1 = jnp.dot(x_bf, wr_ref[...], preferred_element_type=jnp.float32)
    h1 = jnp.maximum(h1 + br_ref[...], 0.0).astype(_COMPUTE_DTYPE)

    # ---- stage h1 into the padded scratch --------------------------------------
    # Only the thin halo ring is zeroed (interior is fully overwritten below).
    # Intentionally NOT a program_id==0-only zero: with "parallel" batch semantics each
    # TensorCore gets its own scratch and only one of them would see step 0.
    zrow = jnp.zeros((d, Wm), h1p_ref.dtype)
    h1p_ref[0:d, :] = zrow
    h1p_ref[d + Ho:Hp, :] = zrow
    zcol = jnp.zeros((Ho, d * midp), h1p_ref.dtype)
    h1p_ref[d:d + Ho, 0:d * midp] = zcol
    h1p_ref[d:d + Ho, (d + Wo) * midp:Wm] = zcol
    h1p_ref[d:d + Ho, d * midp:(d + Wo) * midp] = h1.reshape(Ho, Wo * midp)

    # ---- dilated 3x3 (+ folded BN) + ReLU as ONE K=9*midp GEMM -----------------
    # kx shifts are lane-tile-aligned slices (kx*d*midp % 128 == 0); ky shifts are
    # sublane slices of the 2-D padded buffer.
    for ky in range(3):                                       # static unroll (9 taps)
        for kx in range(3):
            t = ky * 3 + kx
            tap = h1p_ref[ky * d:ky * d + Ho,
                          kx * d * midp:(kx * d + Wo) * midp].reshape(Ho * Wo, midp)
            pat_ref[:, t * midp:(t + 1) * midp] = tap
    h2 = jnp.dot(pat_ref[...], w3_ref[...], preferred_element_type=jnp.float32)
    h2 = jnp.maximum(h2 + b3_ref[...], 0.0).astype(_COMPUTE_DTYPE)

    # ---- increase (1x1 + folded BN) + shortcut + add + ReLU --------------------
    out = jnp.dot(h2, wi_ref[...], preferred_element_type=jnp.float32) + bi_ref[...]
    if has_shortcut:
        out = out + jnp.dot(x_bf, ws_ref[...], preferred_element_type=jnp.float32)
        out = out + bs_ref[...]
    else:
        out = out + x_f32                                     # identity residual, kept f32
    o_ref[...] = jnp.maximum(out, 0.0).reshape(Ho, Wo, -1).astype(o_ref.dtype)


# ------------------------------ pallas_call glue ------------------------------

def _fused_bottleneck(x_nhwc, kp, dilation, has_shortcut, out_dtype):
    """x_nhwc: (N, Ho, Wo, Cin) f32 (already strided). Returns (N, Ho, Wo, out_ch) bf16."""
    N, Ho, Wo, cin = x_nhwc.shape
    midp = kp["wr"].shape[1]
    out_ch = kp["wi"].shape[1]

    kernel = functools.partial(_bottleneck_kernel, dil=dilation, Ho=Ho, Wo=Wo,
                               has_shortcut=has_shortcut)

    in_specs = [
        pl.BlockSpec((None, Ho, Wo, cin), lambda n: (n, 0, 0, 0)),   # x (f32)
        _const_block_spec((cin, midp)),                              # wr
        _const_block_spec((1, midp)),                                # br
        _const_block_spec((9 * midp, midp)),                         # w3 (tap-major)
        _const_block_spec((1, midp)),                                # b3
        _const_block_spec((midp, out_ch)),                           # wi
        _const_block_spec((1, out_ch)),                              # bi
    ]
    args = [x_nhwc, kp["wr"], kp["br"], kp["w3"], kp["b3"], kp["wi"], kp["bi"]]
    if has_shortcut:
        in_specs += [_const_block_spec((cin, out_ch)),               # ws
                     _const_block_spec((1, out_ch))]                 # bs
        args += [kp["ws"], kp["bs"]]

    return pl.pallas_call(
        kernel,
        out_shape=jax.ShapeDtypeStruct((N, Ho, Wo, out_ch), out_dtype),
        grid=(N,),
        in_specs=in_specs,
        out_specs=pl.BlockSpec((None, Ho, Wo, out_ch), lambda n: (n, 0, 0, 0)),
        scratch_shapes=[
            pltpu.VMEM((Ho + 2 * dilation, (Wo + 2 * dilation) * midp), _COMPUTE_DTYPE),
            pltpu.VMEM((Ho * Wo, 9 * midp), _COMPUTE_DTYPE),
        ],
        compiler_params=pltpu.CompilerParams(
            dimension_semantics=("parallel",),
            vmem_limit_bytes=_vmem_limit_bytes()),
    )(*args)


# --------------------------- params / BN folding ------------------------------

def init_params(key, in_ch, out_ch, downsample):
    """Raw PyTorch-style params: dict of (w_OIHW, gamma, beta, running_mean, running_var)."""
    mid = out_ch // _BOTTLENECK_EXPANSION
    ks = jax.random.split(key, 8)

    def conv_w(k, o, i, ksz):
        fan_in = i * ksz * ksz
        return jax.random.normal(k, (o, i, ksz, ksz), jnp.float32) / jnp.sqrt(fan_in)

    def bn(k, c):
        k1, k2, k3, k4 = jax.random.split(k, 4)
        gamma = 1.0 + 0.1 * jax.random.normal(k1, (c,), jnp.float32)
        beta = 0.1 * jax.random.normal(k2, (c,), jnp.float32)
        mean = 0.1 * jax.random.normal(k3, (c,), jnp.float32)
        var = 1.0 + 0.1 * jax.random.uniform(k4, (c,), jnp.float32)
        return gamma, beta, mean, var

    params = {
        "reduce": (conv_w(ks[0], mid, in_ch, 1),) + bn(ks[1], mid),
        "conv3x3": (conv_w(ks[2], mid, mid, 3),) + bn(ks[3], mid),
        "increase": (conv_w(ks[4], out_ch, mid, 1),) + bn(ks[5], out_ch),
    }
    if downsample:
        params["shortcut"] = (conv_w(ks[6], out_ch, in_ch, 1),) + bn(ks[7], out_ch)
    return params


def prepare_kernel_params(params, compute_dtype=_COMPUTE_DTYPE):
    """One-time prep (outside jit): fold BN into conv, pad mid to a multiple of 128,
    pack w3 tap-major as (9*midp, midp), transpose 1x1s to (K, N), cast to bf16."""
    def fold(w, gamma, beta, mean, var):
        scale = gamma / jnp.sqrt(var + _BN_EPS)
        return w * scale[:, None, None, None], beta - mean * scale

    wr, br = fold(*params["reduce"])
    w3, b3 = fold(*params["conv3x3"])
    wi, bi = fold(*params["increase"])

    mid = wr.shape[0]
    midp = max(_round_up(mid, _LANE), _LANE)
    pad_m = midp - mid

    kp = {}
    # reduce: (mid, cin, 1, 1) -> (cin, midp); padded columns are zero so h1[:, mid:] == 0.
    kp["wr"] = jnp.pad(jnp.transpose(wr[:, :, 0, 0]),
                       ((0, 0), (0, pad_m))).astype(compute_dtype)
    kp["br"] = jnp.pad(br, (0, pad_m)).reshape(1, -1).astype(jnp.float32)

    # conv3x3: (mid, mid, 3, 3) -> (3, 3, in, out) -> pad both mid dims -> (9*midp, midp),
    # row block t = ky*3+kx matches the tap ordering of the patch slab.
    w3t = jnp.transpose(w3, (2, 3, 1, 0))
    w3t = jnp.pad(w3t, ((0, 0), (0, 0), (0, pad_m), (0, pad_m)))
    kp["w3"] = w3t.reshape(9 * midp, midp).astype(compute_dtype)
    kp["b3"] = jnp.pad(b3, (0, pad_m)).reshape(1, -1).astype(jnp.float32)

    # increase: (out, mid, 1, 1) -> (midp, out); padded rows are zero (h2 padded cols are 0).
    kp["wi"] = jnp.pad(jnp.transpose(wi[:, :, 0, 0]),
                       ((0, pad_m), (0, 0))).astype(compute_dtype)
    kp["bi"] = bi.reshape(1, -1).astype(jnp.float32)

    if "shortcut" in params:
        ws, bs = fold(*params["shortcut"])
        kp["ws"] = jnp.transpose(ws[:, :, 0, 0]).astype(compute_dtype)
        kp["bs"] = bs.reshape(1, -1).astype(jnp.float32)

    _resolve_weight_pipeline_mode()     # host-side feature detection (outside jit)
    return kp


# -------------------------------- forward pass --------------------------------

def bottleneck_forward_nhwc(x_nhwc, kparams, stride, dilation, downsample):
    """NHWC fast path (keep the surrounding network in NHWC to avoid layout passes)."""
    if stride > 1:
        # 1x1 stride-s conv == 1x1 conv on the strided input (applies to all branches).
        x_nhwc = x_nhwc[:, ::stride, ::stride, :]
    cin = x_nhwc.shape[-1]
    out_ch = kparams["wi"].shape[1]
    if not downsample and (stride != 1 or cin != out_ch):
        raise ValueError("identity shortcut requires stride == 1 and in_ch == out_ch")
    return _fused_bottleneck(x_nhwc, kparams, dilation, downsample, _COMPUTE_DTYPE)


def bottleneck_forward(x_nchw, kparams, stride, dilation, downsample):
    """NCHW public API for parity with the PyTorch module (adds two layout passes)."""
    x = jnp.transpose(x_nchw, (0, 2, 3, 1))                   # NCHW -> NHWC
    out = bottleneck_forward_nhwc(x, kparams, stride, dilation, downsample)
    return jnp.transpose(out, (0, 3, 1, 2))                   # NHWC -> NCHW (bf16)


# ----------------------------- pure-JAX reference -----------------------------

def _ref_forward(x_nchw, params, stride, dilation, downsample):
    x = jnp.transpose(x_nchw, (0, 2, 3, 1))

    def cbr(h, p, s, pad, d, relu):
        w, gamma, beta, mean, var = p
        y = lax.conv_general_dilated(
            h, jnp.transpose(w, (2, 3, 1, 0)), window_strides=(s, s),
            padding=[(pad, pad), (pad, pad)], rhs_dilation=(d, d),
            dimension_numbers=("NHWC", "HWIO", "NHWC"))
        y = (y - mean) * (gamma / jnp.sqrt(var + _BN_EPS)) + beta
        return jnp.maximum(y, 0.0) if relu else y

    h = cbr(x, params["reduce"], stride, 0, 1, True)
    h = cbr(h, params["conv3x3"], 1, dilation, dilation, True)
    h = cbr(h, params["increase"], 1, 0, 1, False)
    sc = cbr(x, params["shortcut"], stride, 0, 1, False) if downsample else x
    return jnp.transpose(jnp.maximum(h + sc, 0.0), (0, 3, 1, 2))


# ------------------------------------ main -------------------------------------

if __name__ == "__main__":
    root = jax.random.PRNGKey(0)
    k_x1, k_p1, k_x2, k_p2 = jax.random.split(root, 4)

    fwd = jax.jit(bottleneck_forward, static_argnums=(2, 3, 4))

    # -- config 1: downsampling bottleneck (stride 2, dilation 2, conv shortcut) --
    in_ch, out_ch = 64, 256
    stride, dilation, downsample = 2, 2, True
    x1 = jax.random.normal(k_x1, (2, in_ch, 16, 16), jnp.float32)       # NCHW
    p1 = init_params(k_p1, in_ch, out_ch, downsample)
    kp1 = prepare_kernel_params(p1)
    out1 = jax.block_until_ready(fwd(x1, kp1, stride, dilation, downsample))
    ref1 = jax.block_until_ready(_ref_forward(x1, p1, stride, dilation, downsample))
    assert out1.shape == ref1.shape == (2, out_ch, 8, 8)
    err1 = float(jnp.max(jnp.abs(out1.astype(jnp.float32) - ref1)))
    tol1 = 5e-2 * (1.0 + float(jnp.max(jnp.abs(ref1))))                 # bf16 math/output
    assert err1 < tol1, (err1, tol1)

    # -- config 2: identity-shortcut bottleneck (stride 1, dilation 2) --
    in_ch2 = out_ch2 = 256
    x2 = jax.random.normal(k_x2, (2, in_ch2, 16, 16), jnp.float32)
    p2 = init_params(k_p2, in_ch2, out_ch2, False)
    kp2 = prepare_kernel_params(p2)
    out2 = jax.block_until_ready(fwd(x2, kp2, 1, 2, False))
    ref2 = jax.block_until_ready(_ref_forward(x2, p2, 1, 2, False))
    assert out2.shape == ref2.shape == (2, out_ch2, 16, 16)
    err2 = float(jnp.max(jnp.abs(out2.astype(jnp.float32) - ref2)))
    tol2 = 5e-2 * (1.0 + float(jnp.max(jnp.abs(ref2))))
    assert err2 < tol2, (err2, tol2)

    print("KERNEL_OK")
</pallas_src>

<mosaic_0001>
module attributes {stable_mosaic.version = 11 : i64} {
  func.func @_probe_kernel(%arg0: i32, %arg1: memref<8x128xf32, #tpu.memory_space<vmem>>, %arg2: memref<8x128xf32, #tpu.memory_space<vmem>>, %arg3: memref<8x128xf32, #tpu.memory_space<vmem>>) attributes {dimension_semantics = [#tpu.dimension_semantics<arbitrary>], iteration_bounds = array<i64: 2>, scalar_prefetch = 0 : i64, scratch_operands = 0 : i64, tpu.core_type = #tpu.core_type<tc>, window_params = [{pipeline_mode = #tpu.pipeline_mode<synchronous>, transform_indices = @transform_0, window_bounds = array<i64: 8, 128>}, {transform_indices = @transform_1, window_bounds = array<i64: 8, 128>}, {transform_indices = @transform_2, window_bounds = array<i64: 8, 128>}]} {
    %c0 = arith.constant 0 : index
    %c0_0 = arith.constant 0 : index
    %0 = vector.load %arg2[%c0, %c0_0] : memref<8x128xf32, #tpu.memory_space<vmem>>, vector<8x128xf32>
    %c0_1 = arith.constant 0 : index
    %c0_2 = arith.constant 0 : index
    %1 = vector.load %arg1[%c0_1, %c0_2] : memref<8x128xf32, #tpu.memory_space<vmem>>, vector<8x128xf32>
    %2 = arith.addf %0, %1 : vector<8x128xf32>
    %c0_3 = arith.constant 0 : index
    %c0_4 = arith.constant 0 : index
    %3 = vector.load %arg3[%c0_3, %c0_4] : memref<8x128xf32, #tpu.memory_space<vmem>>, vector<8x128xf32>
    tpu.vector_store %arg3[%c0_3, %c0_4], %2 {strides = array<i32>} : memref<8x128xf32, #tpu.memory_space<vmem>>, vector<8x128xf32>,
    return
  }
  func.func @transform_0(%arg0: i32) -> (i32, i32) {
    %c0_i32 = arith.constant 0 : i32
    %c0_i32_0 = arith.constant 0 : i32
    %c0_i32_1 = arith.constant 0 : i32
    return %c0_i32, %c0_i32_0 : i32, i32
  }
  func.func @transform_1(%arg0: i32) -> (i32, i32) {
    %c0_i32 = arith.constant 0 : i32
    %c0_i32_0 = arith.constant 0 : i32
    return %arg0, %c0_i32 : i32, i32
  }
  func.func @transform_2(%arg0: i32) -> (i32, i32) {
    %c0_i32 = arith.constant 0 : i32
    %c0_i32_0 = arith.constant 0 : i32
    return %arg0, %c0_i32 : i32, i32
  }
}

module attributes {stable_mosaic.version = 11 : i64} {
  func.func @_bottleneck_kernel(%arg0: i32, %arg1: memref<1x8x8x64xf32, #tpu.memory_space<vmem>>, %arg2: memref<64x128xbf16, #tpu.memory_space<vmem>>, %arg3: memref<1x128xf32, #tpu.memory_space<vmem>>, %arg4: memref<1152x128xbf16, #tpu.memory_space<vmem>>, %arg5: memref<1x128xf32, #tpu.memory_space<vmem>>, %arg6: memref<128x256xbf16, #tpu.memory_space<vmem>>, %arg7: memref<1x256xf32, #tpu.memory_space<vmem>>, %arg8: memref<64x256xbf16, #tpu.memory_space<vmem>>, %arg9: memref<1x256xf32, #tpu.memory_space<vmem>>, %arg10: memref<1x8x8x256xbf16, #tpu.memory_space<vmem>>, %arg11: memref<12x1536xbf16, #tpu.memory_space<vmem>>, %arg12: memref<64x1152xbf16, #tpu.memory_space<vmem>>) attributes {dimension_semantics = [#tpu.dimension_semantics<parallel>], iteration_bounds = array<i64: 2>, scalar_prefetch = 0 : i64, scratch_operands = 2 : i64, tpu.core_type = #tpu.core_type<tc>, window_params = [{transform_indices = @transform_0, window_bounds = array<i64: 1, 8, 8, 64>}, {pipeline_mode = #tpu.pipeline_mode<synchronous>, transform_indices = @transform_1, window_bounds = array<i64: 64, 128>}, {pipeline_mode = #tpu.pipeline_mode<synchronous>, transform_indices = @transform_2, window_bounds = array<i64: 1, 128>}, {pipeline_mode = #tpu.pipeline_mode<synchronous>, transform_indices = @transform_3, window_bounds = array<i64: 1152, 128>}, {pipeline_mode = #tpu.pipeline_mode<synchronous>, transform_indices = @transform_4, window_bounds = array<i64: 1, 128>}, {pipeline_mode = #tpu.pipeline_mode<synchronous>, transform_indices = @transform_5, window_bounds = array<i64: 128, 256>}, {pipeline_mode = #tpu.pipeline_mode<synchronous>, transform_indices = @transform_6, window_bounds = array<i64: 1, 256>}, {pipeline_mode = #tpu.pipeline_mode<synchronous>, transform_indices = @transform_7, window_bounds = array<i64: 64, 256>}, {pipeline_mode = #tpu.pipeline_mode<synchronous>, transform_indices = @transform_8, window_bounds = array<i64: 1, 256>}, {transform_indices = @transform_9, window_bounds = array<i64: 1, 8, 8, 256>}]} {
    %c0 = arith.constant 0 : index
    %c0_0 = arith.constant 0 : index
    %c0_1 = arith.constant 0 : index
    %c0_2 = arith.constant 0 : index
    %0 = vector.load %arg1[%c0, %c0_0, %c0_1, %c0_2] : memref<1x8x8x64xf32, #tpu.memory_space<vmem>>, vector<1x8x8x64xf32>
    %1 = vector.shape_cast %0 : vector<1x8x8x64xf32> to vector<8x8x64xf32>
    %2 = vector.shape_cast %1 : vector<8x8x64xf32> to vector<64x64xf32>
    %3 = arith.truncf %2 : vector<64x64xf32> to vector<64x64xbf16>
    %c0_3 = arith.constant 0 : index
    %c0_4 = arith.constant 0 : index
    %4 = vector.load %arg2[%c0_3, %c0_4] : memref<64x128xbf16, #tpu.memory_space<vmem>>, vector<64x128xbf16>
    %cst = arith.constant dense<0.000000e+00> : vector<64x128xf32>
    %5 = tpu.matmul %3, %4, %cst {dimension_numbers = #tpu.dot_dimension_numbers<[1], [0], [0], [1], [0, 0, 1, 1], [], []>} : vector<64x64xbf16>, vector<64x128xbf16>, vector<64x128xf32> -> vector<64x128xf32>
    %c0_5 = arith.constant 0 : index
    %c0_6 = arith.constant 0 : index
    %6 = vector.load %arg3[%c0_5, %c0_6] : memref<1x128xf32, #tpu.memory_space<vmem>>, vector<1x128xf32>
    %7 = vector.broadcast %6 : vector<1x128xf32> to vector<64x128xf32>
    %8 = arith.addf %5, %7 : vector<64x128xf32>
    %cst_7 = arith.constant 0.000000e+00 : f32
    %9 = vector.broadcast %cst_7 : f32 to vector<64x128xf32>
    %10 = arith.maximumf %8, %9 : vector<64x128xf32>
    %11 = arith.truncf %10 : vector<64x128xf32> to vector<64x128xbf16>
    %cst_8 = arith.constant 0.000000e+00 : bf16
    %12 = vector.broadcast %cst_8 : bf16 to vector<2x1536xbf16>
    %c0_9 = arith.constant 0 : index
    %c0_10 = arith.constant 0 : index
    %13 = vector.load %arg11[%c0_9, %c0_10] : memref<12x1536xbf16, #tpu.memory_space<vmem>>, vector<2x1536xbf16>
    tpu.vector_store %arg11[%c0_9, %c0_10], %12 {strides = array<i32>} : memref<12x1536xbf16, #tpu.memory_space<vmem>>, vector<2x1536xbf16>,
    %c10 = arith.constant 10 : index
    %c0_11 = arith.constant 0 : index
    %14 = vector.load %arg11[%c10, %c0_11] : memref<12x1536xbf16, #tpu.memory_space<vmem>>, vector<2x1536xbf16>
    tpu.vector_store %arg11[%c10, %c0_11], %12 {strides = array<i32>} : memref<12x1536xbf16, #tpu.memory_space<vmem>>, vector<2x1536xbf16>,
    %cst_12 = arith.constant 0.000000e+00 : bf16
    %15 = vector.broadcast %cst_12 : bf16 to vector<8x256xbf16>
    %c2 = arith.constant 2 : index
    %c0_13 = arith.constant 0 : index
    %16 = vector.load %arg11[%c2, %c0_13] : memref<12x1536xbf16, #tpu.memory_space<vmem>>, vector<8x256xbf16>
    tpu.vector_store %arg11[%c2, %c0_13], %15 {strides = array<i32>} : memref<12x1536xbf16, #tpu.memory_space<vmem>>, vector<8x256xbf16>,
    %c2_14 = arith.constant 2 : index
    %c1280 = arith.constant 1280 : index
    %17 = vector.load %arg11[%c2_14, %c1280] : memref<12x1536xbf16, #tpu.memory_space<vmem>>, vector<8x256xbf16>
    tpu.vector_store %arg11[%c2_14, %c1280], %15 {strides = array<i32>} : memref<12x1536xbf16, #tpu.memory_space<vmem>>, vector<8x256xbf16>,
    %18 = vector.shape_cast %11 : vector<64x128xbf16> to vector<8x1024xbf16>
    %c2_15 = arith.constant 2 : index
    %c256 = arith.constant 256 : index
    %19 = vector.load %arg11[%c2_15, %c256] : memref<12x1536xbf16, #tpu.memory_space<vmem>>, vector<8x1024xbf16>
    tpu.vector_store %arg11[%c2_15, %c256], %18 {strides = array<i32>} : memref<12x1536xbf16, #tpu.memory_space<vmem>>, vector<8x1024xbf16>,
    %c0_16 = arith.constant 0 : index
    %c0_17 = arith.constant 0 : index
    %20 = vector.load %arg11[%c0_16, %c0_17] : memref<12x1536xbf16, #tpu.memory_space<vmem>>, vector<8x1024xbf16>
    %21 = vector.shape_cast %20 : vector<8x1024xbf16> to vector<64x128xbf16>
    %c0_18 = arith.constant 0 : index
    %c0_19 = arith.constant 0 : index
    %22 = vector.load %arg12[%c0_18, %c0_19] : memref<64x1152xbf16, #tpu.memory_space<vmem>>, vector<64x128xbf16>
    tpu.vector_store %arg12[%c0_18, %c0_19], %21 {strides = array<i32>} : memref<64x1152xbf16, #tpu.memory_space<vmem>>, vector<64x128xbf16>,
    %c0_20 = arith.constant 0 : index
    %c256_21 = arith.constant 256 : index
    %23 = vector.load %arg11[%c0_20, %c256_21] : memref<12x1536xbf16, #tpu.memory_space<vmem>>, vector<8x1024xbf16>
    %24 = vector.shape_cast %23 : vector<8x1024xbf16> to vector<64x128xbf16>
    %c0_22 = arith.constant 0 : index
    %c128 = arith.constant 128 : index
    %25 = vector.load %arg12[%c0_22, %c128] : memref<64x1152xbf16, #tpu.memory_space<vmem>>, vector<64x128xbf16>
    tpu.vector_store %arg12[%c0_22, %c128], %24 {strides = array<i32>} : memref<64x1152xbf16, #tpu.memory_space<vmem>>, vector<64x128xbf16>,
    %c0_23 = arith.constant 0 : index
    %c512 = arith.constant 512 : index
    %26 = vector.load %arg11[%c0_23, %c512] : memref<12x1536xbf16, #tpu.memory_space<vmem>>, vector<8x1024xbf16>
    %27 = vector.shape_cast %26 : vector<8x1024xbf16> to vector<64x128xbf16>
    %c0_24 = arith.constant 0 : index
    %c256_25 = arith.constant 256 : index
    %28 = vector.load %arg12[%c0_24, %c256_25] : memref<64x1152xbf16, #tpu.memory_space<vmem>>, vector<64x128xbf16>
    tpu.vector_store %arg12[%c0_24, %c256_25], %27 {strides = array<i32>} : memref<64x1152xbf16, #tpu.memory_space<vmem>>, vector<64x128xbf16>,
    %c2_26 = arith.constant 2 : index
    %c0_27 = arith.constant 0 : index
    %29 = vector.load %arg11[%c2_26, %c0_27] : memref<12x1536xbf16, #tpu.memory_space<vmem>>, vector<8x1024xbf16>
    %30 = vector.shape_cast %29 : vector<8x1024xbf16> to vector<64x128xbf16>
    %c0_28 = arith.constant 0 : index
    %c384 = arith.constant 384 : index
    %31 = vector.load %arg12[%c0_28, %c384] : memref<64x1152xbf16, #tpu.memory_space<vmem>>, vector<64x128xbf16>
    tpu.vector_store %arg12[%c0_28, %c384], %30 {strides = array<i32>} : memref<64x1152xbf16, #tpu.memory_space<vmem>>, vector<64x128xbf16>,
    %c2_29 = arith.constant 2 : index
    %c256_30 = arith.constant 256 : index
    %32 = vector.load %arg11[%c2_29, %c256_30] : memref<12x1536xbf16, #tpu.memory_space<vmem>>, vector<8x1024xbf16>
    %33 = vector.shape_cast %32 : vector<8x1024xbf16> to vector<64x128xbf16>
    %c0_31 = arith.constant 0 : index
    %c512_32 = arith.constant 512 : index
    %34 = vector.load %arg12[%c0_31, %c512_32] : memref<64x1152xbf16, #tpu.memory_space<vmem>>, vector<64x128xbf16>
    tpu.vector_store %arg12[%c0_31, %c512_32], %33 {strides = array<i32>} : memref<64x1152xbf16, #tpu.memory_space<vmem>>, vector<64x128xbf16>,
    %c2_33 = arith.constant 2 : index
    %c512_34 = arith.constant 512 : index
    %35 = vector.load %arg11[%c2_33, %c512_34] : memref<12x1536xbf16, #tpu.memory_space<vmem>>, vector<8x1024xbf16>
    %36 = vector.shape_cast %35 : vector<8x1024xbf16> to vector<64x128xbf16>
    %c0_35 = arith.constant 0 : index
    %c640 = arith.constant 640 : index
    %37 = vector.load %arg12[%c0_35, %c640] : memref<64x1152xbf16, #tpu.memory_space<vmem>>, vector<64x128xbf16>
    tpu.vector_store %arg12[%c0_35, %c640], %36 {strides = array<i32>} : memref<64x1152xbf16, #tpu.memory_space<vmem>>, vector<64x128xbf16>,
    %c4 = arith.constant 4 : index
    %c0_36 = arith.constant 0 : index
    %38 = vector.load %arg11[%c4, %c0_36] : memref<12x1536xbf16, #tpu.memory_space<vmem>>, vector<8x1024xbf16>
    %39 = vector.shape_cast %38 : vector<8x1024xbf16> to vector<64x128xbf16>
    %c0_37 = arith.constant 0 : index
    %c768 = arith.constant 768 : index
    %40 = vector.load %arg12[%c0_37, %c768] : memref<64x1152xbf16, #tpu.memory_space<vmem>>, vector<64x128xbf16>
    tpu.vector_store %arg12[%c0_37, %c768], %39 {strides = array<i32>} : memref<64x1152xbf16, #tpu.memory_space<vmem>>, vector<64x128xbf16>,
    %c4_38 = arith.constant 4 : index
    %c256_39 = arith.constant 256 : index
    %41 = vector.load %arg11[%c4_38, %c256_39] : memref<12x1536xbf16, #tpu.memory_space<vmem>>, vector<8x1024xbf16>
    %42 = vector.shape_cast %41 : vector<8x1024xbf16> to vector<64x128xbf16>
    %c0_40 = arith.constant 0 : index
    %c896 = arith.constant 896 : index
    %43 = vector.load %arg12[%c0_40, %c896] : memref<64x1152xbf16, #tpu.memory_space<vmem>>, vector<64x128xbf16>
    tpu.vector_store %arg12[%c0_40, %c896], %42 {strides = array<i32>} : memref<64x1152xbf16, #tpu.memory_space<vmem>>, vector<64x128xbf16>,
    %c4_41 = arith.constant 4 : index
    %c512_42 = arith.constant 512 : index
    %44 = vector.load %arg11[%c4_41, %c512_42] : memref<12x1536xbf16, #tpu.memory_space<vmem>>, vector<8x1024xbf16>
    %45 = vector.shape_cast %44 : vector<8x1024xbf16> to vector<64x128xbf16>
    %c0_43 = arith.constant 0 : index
    %c1024 = arith.constant 1024 : index
    %46 = vector.load %arg12[%c0_43, %c1024] : memref<64x1152xbf16, #tpu.memory_space<vmem>>, vector<64x128xbf16>
    tpu.vector_store %arg12[%c0_43, %c1024], %45 {strides = array<i32>} : memref<64x1152xbf16, #tpu.memory_space<vmem>>, vector<64x128xbf16>,
    %c0_44 = arith.constant 0 : index
    %c0_45 = arith.constant 0 : index
    %47 = vector.load %arg12[%c0_44, %c0_45] : memref<64x1152xbf16, #tpu.memory_space<vmem>>, vector<64x1152xbf16>
    %c0_46 = arith.constant 0 : index
    %c0_47 = arith.constant 0 : index
    %48 = vector.load %arg4[%c0_46, %c0_47] : memref<1152x128xbf16, #tpu.memory_space<vmem>>, vector<1152x128xbf16>
    %cst_48 = arith.constant dense<0.000000e+00> : vector<64x128xf32>
    %49 = tpu.matmul %47, %48, %cst_48 {dimension_numbers = #tpu.dot_dimension_numbers<[1], [0], [0], [1], [0, 0, 1, 1], [], []>} : vector<64x1152xbf16>, vector<1152x128xbf16>, vector<64x128xf32> -> vector<64x128xf32>
    %c0_49 = arith.constant 0 : index
    %c0_50 = arith.constant 0 : index
    %50 = vector.load %arg5[%c0_49, %c0_50] : memref<1x128xf32, #tpu.memory_space<vmem>>, vector<1x128xf32>
    %51 = vector.broadcast %50 : vector<1x128xf32> to vector<64x128xf32>
    %52 = arith.addf %49, %51 : vector<64x128xf32>
    %cst_51 = arith.constant 0.000000e+00 : f32
    %53 = vector.broadcast %cst_51 : f32 to vector<64x128xf32>
    %54 = arith.maximumf %52, %53 : vector<64x128xf32>
    %55 = arith.truncf %54 : vector<64x128xf32> to vector<64x128xbf16>
    %c0_52 = arith.constant 0 : index
    %c0_53 = arith.constant 0 : index
    %56 = vector.load %arg6[%c0_52, %c0_53] : memref<128x256xbf16, #tpu.memory_space<vmem>>, vector<128x256xbf16>
    %cst_54 = arith.constant dense<0.000000e+00> : vector<64x256xf32>
    %57 = tpu.matmul %55, %56, %cst_54 {dimension_numbers = #tpu.dot_dimension_numbers<[1], [0], [0], [1], [0, 0, 1, 1], [], []>} : vector<64x128xbf16>, vector<128x256xbf16>, vector<64x256xf32> -> vector<64x256xf32>
    %c0_55 = arith.constant 0 : index
    %c0_56 = arith.constant 0 : index
    %58 = vector.load %arg7[%c0_55, %c0_56] : memref<1x256xf32, #tpu.memory_space<vmem>>, vector<1x256xf32>
    %59 = vector.broadcast %58 : vector<1x256xf32> to vector<64x256xf32>
    %60 = arith.addf %57, %59 : vector<64x256xf32>
    %c0_57 = arith.constant 0 : index
    %c0_58 = arith.constant 0 : index
    %61 = vector.load %arg8[%c0_57, %c0_58] : memref<64x256xbf16, #tpu.memory_space<vmem>>, vector<64x256xbf16>
    %cst_59 = arith.constant dense<0.000000e+00> : vector<64x256xf32>
    %62 = tpu.matmul %3, %61, %cst_59 {dimension_numbers = #tpu.dot_dimension_numbers<[1], [0], [0], [1], [0, 0, 1, 1], [], []>} : vector<64x64xbf16>, vector<64x256xbf16>, vector<64x256xf32> -> vector<64x256xf32>
    %63 = arith.addf %60, %62 : vector<64x256xf32>
    %c0_60 = arith.constant 0 : index
    %c0_61 = arith.constant 0 : index
    %64 = vector.load %arg9[%c0_60, %c0_61] : memref<1x256xf32, #tpu.memory_space<vmem>>, vector<1x256xf32>
    %65 = vector.broadcast %64 : vector<1x256xf32> to vector<64x256xf32>
    %66 = arith.addf %63, %65 : vector<64x256xf32>
    %cst_62 = arith.constant 0.000000e+00 : f32
    %67 = vector.broadcast %cst_62 : f32 to vector<64x256xf32>
    %68 = arith.maximumf %66, %67 : vector<64x256xf32>
    %69 = vector.shape_cast %68 : vector<64x256xf32> to vector<8x8x256xf32>
    %70 = arith.truncf %69 : vector<8x8x256xf32> to vector<8x8x256xbf16>
    %c0_63 = arith.constant 0 : index
    %c0_64 = arith.constant 0 : index
    %c0_65 = arith.constant 0 : index
    %c0_66 = arith.constant 0 : index
    %71 = vector.load %arg10[%c0_63, %c0_64, %c0_65, %c0_66] : memref<1x8x8x256xbf16, #tpu.memory_space<vmem>>, vector<1x8x8x256xbf16>
    %72 = vector.shape_cast %71 : vector<1x8x8x256xbf16> to vector<8x8x256xbf16>
    %73 = vector.shape_cast %70 : vector<8x8x256xbf16> to vector<1x8x8x256xbf16>
    tpu.vector_store %arg10[%c0_63, %c0_64, %c0_65, %c0_66], %73 {strides = array<i32>} : memref<1x8x8x256xbf16, #tpu.memory_space<vmem>>, vector<1x8x8x256xbf16>,
    return
  }
  func.func @transform_0(%arg0: i32) -> (i32, i32, i32, i32) {
    %c0_i32 = arith.constant 0 : i32
    %c0_i32_0 = arith.constant 0 : i32
    %c0_i32_1 = arith.constant 0 : i32
    %c0_i32_2 = arith.constant 0 : i32
    return %arg0, %c0_i32, %c0_i32_0, %c0_i32_1 : i32, i32, i32, i32
  }
  func.func @transform_1(%arg0: i32) -> (i32, i32) {
    %c0_i32 = arith.constant 0 : i32
    %c0_i32_0 = arith.constant 0 : i32
    %c0_i32_1 = arith.constant 0 : i32
    return %c0_i32, %c0_i32_0 : i32, i32
  }
  func.func @transform_2(%arg0: i32) -> (i32, i32) {
    %c0_i32 = arith.constant 0 : i32
    %c0_i32_0 = arith.constant 0 : i32
    %c0_i32_1 = arith.constant 0 : i32
    return %c0_i32, %c0_i32_0 : i32, i32
  }
  func.func @transform_3(%arg0: i32) -> (i32, i32) {
    %c0_i32 = arith.constant 0 : i32
    %c0_i32_0 = arith.constant 0 : i32
    %c0_i32_1 = arith.constant 0 : i32
    return %c0_i32, %c0_i32_0 : i32, i32
  }
  func.func @transform_4(%arg0: i32) -> (i32, i32) {
    %c0_i32 = arith.constant 0 : i32
    %c0_i32_0 = arith.constant 0 : i32
    %c0_i32_1 = arith.constant 0 : i32
    return %c0_i32, %c0_i32_0 : i32, i32
  }
  func.func @transform_5(%arg0: i32) -> (i32, i32) {
    %c0_i32 = arith.constant 0 : i32
    %c0_i32_0 = arith.constant 0 : i32
    %c0_i32_1 = arith.constant 0 : i32
    return %c0_i32, %c0_i32_0 : i32, i32
  }
  func.func @transform_6(%arg0: i32) -> (i32, i32) {
    %c0_i32 = arith.constant 0 : i32
    %c0_i32_0 = arith.constant 0 : i32
    %c0_i32_1 = arith.constant 0 : i32
    return %c0_i32, %c0_i32_0 : i32, i32
  }
  func.func @transform_7(%arg0: i32) -> (i32, i32) {
    %c0_i32 = arith.constant 0 : i32
    %c0_i32_0 = arith.constant 0 : i32
    %c0_i32_1 = arith.constant 0 : i32
    return %c0_i32, %c0_i32_0 : i32, i32
  }
  func.func @transform_8(%arg0: i32) -> (i32, i32) {
    %c0_i32 = arith.constant 0 : i32
    %c0_i32_0 = arith.constant 0 : i32
    %c0_i32_1 = arith.constant 0 : i32
    return %c0_i32, %c0_i32_0 : i32, i32
  }
  func.func @transform_9(%arg0: i32) -> (i32, i32, i32, i32) {
    %c0_i32 = arith.constant 0 : i32
    %c0_i32_0 = arith.constant 0 : i32
    %c0_i32_1 = arith.constant 0 : i32
    %c0_i32_2 = arith.constant 0 : i32
    return %arg0, %c0_i32, %c0_i32_0, %c0_i32_1 : i32, i32, i32, i32
  }
}

</mosaic_0001>

<bundles_post_ra>
// kernel: tpu_custom_call.1
= control target key start
LH: loop header
LB: loop body
LE: loop exit
PB: predicated region body
PF: predicated region fallthrough
CT: control target
= control target key end

     0   :  { %7 = vsyncpa [#allocation3], 0  ;;  %s692_s0 = inlined_call_operand.hbm [shape: f32[8,128], index: 0, kind: input, shape index: {}]   ;;  %s693_s1 = inlined_call_operand.hbm [shape: f32[16,128], index: 1, kind: input, shape index: {}]   ;;  %s694_s2 = inlined_call_operand.hbm [shape: f32[16,128], index: 2, kind: output, shape index: {}]  }
   0x1   :  { %8 = vsyncpa [#allocation6], 0 }
   0x2   :  { %10 = vsyncpa [#allocation6 + $0x1], 0 }
   0x3   :  { %11 = vsyncpa [#allocation4], 0 }
   0x4   :  { %13 = vsyncpa [#allocation4 + $0x1], 0  ;;  %s491_s9 = smov 0   ;;  %s493_s10 = smov 0  }
   0x5   :  { %s495_s11 = smov 0   ;;  %s497_s12 = smov 0  }
   0x6 LB: > { %s512_s13 = sadd.s32 4294967295, %s471_s12   ;;  %s272_s14 = sadd.s32 4294967294, %s471_s12   ;;  %s471_s12 = sphi %s497_s12, %s718_s12   ;;  %s467_s11 = sphi %s495_s11, %s717_s11   ;;  %s463_s10 = sphi %s493_s10, %s716_s10   ;;  %s459_s9 = sphi %s491_s9, %s715_s9  }
   0x7   : > { %p60_p0 = scmp.ne.s32.totalorder %s463_s10, %s459_s9  ;;  %p695_p1 = scmp.eq.s32.totalorder %s512_s13, 0 }
   0x8   : > { %p90_p3 = scmp.eq.s32.totalorder %s272_s14, 1  ;;  %p273_p5 = scmp.ge.s32.totalorder %s471_s12, 1 }
   0x9   : > { %p521_p4 = por %p695_p1, %p60_p0  ;;  %p97_p7 = scmp.lt.s32.totalorder %s471_s12, 3 }
   0xa   : > { %p526_p6 = por %p90_p3, %p60_p0  ;;  %s473_s18 = smov [#allocation2]  }
   0xb   : > { %s698_s15 = scalar_select %p521_p4, 1, 0 }
   0xc   : > { %s699_s16 = scalar_select %p526_p6, 1, 0 }
   0xd   : > { %p531_p8 = pnand %p273_p5, %p97_p7  ;;  %s110_s19 = sshll.u32 %s473_s18, 4  ;;  %s111_s19 = int_to_ptr.vmem [resolvable:$true] %s110_s19 }
   0xe   : > { %s539_s20 = sadd.s32 1, %s471_s12   ;;  %s47_s24 = sadd.s32 1, %s467_s11 }
   0xf   : > { %s700_s17 = scalar_select %p531_p8, 1, 0 }
  0x10   : > { %p294_p10 = pneg %p531_p8  ;;  %s44_s22 = ssub.s32 %s471_s12, %s539_s20 }
  0x11   : > { %p549_p12 = scmp.eq.s32.totalorder %s44_s22, 0  ;;  %s343_s27 = scalar_lea.hbm %s692_s0, 128 }
  0x12   : > { %p543_p11 = pnand %p294_p10, %p695_p1  ;;  %p344_p0 = scmp.ne.s32.totalorder %s692_s0, %s343_s27 }
  0x13   : > { %s702_s23 = scalar_select %p549_p12, 1, 0 }
  0x14   : > { %p345_p3 = pneg %p543_p11  ;;  %p350_p10 = scmp.lt.u32.totalorder %s343_s27, %s692_s0 }
  0x16   : > { %p346_p5 = pnand %p345_p3, %p344_p0 }
  0x18   : > { %p347_p7 = pneg %p346_p5 }
  0x1a   : > { %p352_p9 = pnand %p350_p10, %p347_p7 }
  0x1c   : > { %355 = shalt.err (!%p352_p9)
}
  0x1d   : > { %s356_s4 = scalar_lea.vmem %s111_s19, 128  ;;  %p364_p6 = scmp.lt.s32.totalorder %s111_s19, %s111_s19 }
  0x1e   : > { %p357_p1 = scmp.ne.s32.totalorder %s111_s19, %s356_s4  ;;  %p365_p4 = scmp.lt.s32.totalorder %s356_s4, %s356_s4 }
  0x20   : > { %p359_p2 = pnand %p357_p1, %p345_p3  ;;  %p366_p8 = por %p365_p4, %p364_p6 }
  0x22   : > { %p360_p13 = pneg %p359_p2 }
  0x24   : > { %p367_p12 = pnand %p366_p8, %p360_p13 }
  0x26   : > { %370 = shalt.err (!%p367_p12)
}
  0x27   : > { %297 = dma.hbm_to_vmem [thread:$0]  (!%p543_p11), %s692_s0, 128, %s111_s19, [#allocation3]  }
  0x28   : > { %p703_p1 = scmp.ne.s32.totalorder %s702_s23, 0  ;;  %p55_p2 = scmp.eq.s32.totalorder %s471_s12, 0 }
  0x29   : > { %p704_p4 = scmp.ne.s32.totalorder %s467_s11, %s463_s10  ;;  %p705_p6 = scmp.eq.s32.totalorder %s512_s13, 1 }
  0x2a   : > { %s575_s7 = scalar_select %p703_p1, %s467_s11, %s47_s24  }
  0x2b   : > { %p583_p8 = por %p705_p6, %p704_p4  ;;  %p307_p9 = scmp.lt.s32.totalorder %s471_s12, 2 }
  0x2c   : > { %s121_s14 = sand.u32 1, %s467_s11   ;;  %p707_p12 = pmov %p704_p4 }
  0x2d   : > { %s276_s18 = sshll.u32 %s121_s14, 3  ;;  %s277_s21 = sshll.u32 %s471_s12, 7 }
  0x2e   : > { %p56_p13 = por %p55_p2, %p707_p12  ;;  %s596_s19 = scalar_lea.hbm %s693_s1, %s277_s21 }
  0x2f   : > { %s125_s23 = scalar_lea.vmem [#allocation5], %s276_s18  ;;  %s122_s27 = scalar_lea.sflag [#allocation6], %s121_s14 }
  0x30   : > { %s132_s24 = sshll.u32 %s125_s23, 4  ;;  %p598_p11 = pnand %p307_p9, %p56_p13  ;;  %s602_s24 = int_to_ptr.vmem [resolvable:$true] %s132_s24 }
  0x31   : > { %s371_s28 = scalar_lea.hbm %s596_s19, 128  ;;  %s376_s3 = scalar_lea.hbm %s693_s1, 256 }
  0x32   : > { %p372_p0 = scmp.ne.s32.totalorder %s596_s19, %s371_s28  ;;  %p373_p3 = pneg %p598_p11 }
  0x33   : > { %p377_p10 = scmp.lt.u32.totalorder %s596_s19, %s693_s1  ;;  %p378_p1 = scmp.lt.u32.totalorder %s376_s3, %s371_s28 }
  0x34   : > { %p374_p5 = pnand %p373_p3, %p372_p0  ;;  %p380_p4 = scmp.lt.u32.totalorder %s371_s28, %s596_s19 }
  0x35   : > { %p379_p2 = por %p378_p1, %p377_p10 }
  0x36   : > { %p375_p7 = pneg %p374_p5 }
  0x37   : > { %p381_p6 = por %p380_p4, %p379_p2 }
  0x39   : > { %p382_p9 = pnand %p381_p6, %p375_p7 }
  0x3b   : > { %385 = shalt.err (!%p382_p9)
}
  0x3c   : > { %s386_s6 = scalar_lea.vmem %s602_s24, 128  ;;  %s474_s14 = smov [#allocation5]  }
  0x3d   : > { %p387_p12 = scmp.ne.s32.totalorder %s602_s24, %s386_s6  ;;  %s391_s18 = sshll.u32 %s474_s14, 4  ;;  %s392_s18 = int_to_ptr.vmem [resolvable:$false] %s391_s18 }
  0x3e   : > { %s393_s21 = scalar_lea.vmem %s392_s18, 256  ;;  %p394_p5 = scmp.lt.s32.totalorder %s602_s24, %s392_s18 }
  0x3f   : > { %p389_p13 = pnand %p387_p12, %p373_p3  ;;  %p395_p10 = scmp.lt.s32.totalorder %s393_s21, %s386_s6 }
  0x41   : > { %p390_p0 = pneg %p389_p13  ;;  %p396_p1 = por %p395_p10, %p394_p5 }
  0x43   : > { %p397_p2 = pnand %p396_p1, %p390_p0 }
  0x45   : > { %400 = shalt.err (!%p397_p2)
}
  0x46   : > { %301 = dma.hbm_to_vmem [thread:$0]  (!%p598_p11), %s596_s19, 128, %s602_s24, %s122_s27  }
  0x47   : > { %p709_p7 = scmp.ne.s32.totalorder %s700_s17, 0 }
  0x48   : > { %p710_p3 = scmp.eq.s32.totalorder (!%p709_p7), %s512_s13, 0 }
  0x49   : > { %141 = sbr.rel (%p709_p7) target bundleno = 110 (0x6e), region = 28 }
  0x50   : > { %446 = dma.done.wait (%p710_p3), [#allocation3], 128   ;;  %p711_p4 = pmov %p710_p3 }
  0x51   : > { %s636_s22 = sand.u32 1, %s463_s10   ;;  %p712_p6 = scmp.ne.s32.totalorder %s698_s15, 0 }
  0x52   : > { %448 = vsyncadd (%p711_p4), [#allocation3], 4294967168  ;;  %s280_s25 = sshll.u32 %s636_s22, 3  ;;  %s148_s23 = scalar_lea.sflag [#allocation6], %s636_s22 }
  0x53   : > { %s151_s26 = scalar_lea.vmem [#allocation5], %s280_s25 }
  0x54   : > { %450 = dma.done.wait (%p712_p6), %s148_s23, 128  }
  0x55   : > { %452 = vsyncadd (%p712_p6), %s148_s23, 4294967168  ;;  %s171_s17 = scalar_lea.vmem [#allocation7], %s280_s25  ;;  %s283_s24 = sshll.u32 %s512_s13, 7  ;;  %v172_v0 = vld [vmem:[%s151_s26] sm:$0xff]  ;;  %v173_v1 = vld [vmem:[#allocation2] sm:$0xff] }
  0x56   : > { %s190_s19 = sshll.u32 %s171_s17, 4  ;;  %v174_v2 = vadd.f32 %v173_v1, %v172_v0  ;;  %s650_s29 = scalar_lea.hbm %s694_s2, %s283_s24  ;;  %s645_s19 = int_to_ptr.vmem [resolvable:$true] %s190_s19 }
  0x57   : > { %s177_s15 = scalar_lea.sflag [#allocation4], %s636_s22  ;;  %s401_s30 = scalar_lea.vmem %s645_s19, 128 }
  0x58   : > { %175 = vst [vmem:[%s171_s17] sm:$0xff] %v174_v2  ;;  %p402_p11 = scmp.ne.s32.totalorder %s645_s19, %s401_s30  ;;  %s475_s13 = smov [#allocation7]  }
  0x59   : > { %s405_s3 = sshll.u32 %s475_s13, 4  ;;  %s406_s3 = int_to_ptr.vmem [resolvable:$false] %s405_s3 }
  0x5a   : > { %p403_p9 = pnand %p402_p11, %p583_p8  ;;  %s407_s4 = scalar_lea.vmem %s406_s3, 256 }
  0x5b   : > { %p408_p13 = scmp.lt.s32.totalorder %s645_s19, %s406_s3  ;;  %p409_p0 = scmp.lt.s32.totalorder %s407_s4, %s401_s30 }
  0x5c   : > { %p404_p12 = pneg %p403_p9 }
  0x5d   : > { %p410_p5 = por %p409_p0, %p408_p13 }
  0x5f   : > { %p411_p10 = pnand %p410_p5, %p404_p12 }
  0x61   : > { %414 = shalt.err (!%p411_p10)
}
  0x62   : > { %s415_s5 = scalar_lea.hbm %s650_s29, 128  ;;  %s419_s18 = scalar_lea.hbm %s694_s2, 256 }
  0x63   : > { %p416_p1 = scmp.ne.s32.totalorder %s650_s29, %s415_s5  ;;  %p420_p3 = scmp.lt.u32.totalorder %s650_s29, %s694_s2 }
  0x64   : > { %p421_p4 = scmp.lt.u32.totalorder %s419_s18, %s415_s5  ;;  %p423_p11 = scmp.lt.u32.totalorder %s415_s5, %s650_s29 }
  0x65   : > { %p417_p2 = pnand %p416_p1, %p583_p8 }
  0x66   : > { %p422_p6 = por %p421_p4, %p420_p3 }
  0x67   : > { %p418_p7 = pneg %p417_p2 }
  0x68   : > { %p424_p9 = por %p423_p11, %p422_p6 }
  0x6a   : > { %p425_p12 = pnand %p424_p9, %p418_p7 }
  0x6c   : > { %428 = shalt.err (!%p425_p12)
}
  0x6d   : > { %292 = dma.vmem_to_hbm [thread:$0]  (%p583_p8), %s645_s19, 128, %s650_s29, %s177_s15  }
  0x6e PF: > { %s202_s25 = sand.u32 1, %s459_s9   ;;  %p713_p13 = scmp.ne.s32.totalorder %s699_s16, 0 }
  0x6f   : > { %p714_p0 = scmp.ge.s32.totalorder %s471_s12, 2  ;;  %s203_s23 = scalar_lea.sflag [#allocation4], %s202_s25 }
  0x71   : > { %p303_p5 = pnand %p714_p0, %p713_p13 }
  0x73   : > { %454 = dma.done.wait (!%p303_p5), %s203_s23, 128  }
  0x74   : > { %456 = vsyncadd (!%p303_p5), %s203_s23, 4294967168  ;;  %p16_p10 = scmp.ge.s32.totalorder %s539_s20, 4   ;;  %s715_s9 = smov %s463_s10 }
  0x75   : > { %s716_s10 = smov %s467_s11  ;;  %s717_s11 = smov %s575_s7 }
  0x76   : > { %s718_s12 = smov %s539_s20  ;;  %18 = sbr.rel (!%p16_p10) target bundleno = 6 (0x6), region = 78 }
  0x7d   :  { %208 = vsyncpa [#allocation3], 1 }
  0x7e   :  { %210 = vsyncpa [#allocation3 + $0x1], 1 }
  0x7f   :  { %211 = vsyncpa [#allocation6], 1 }
  0x80   :  { %213 = vsyncpa [#allocation6 + $0x1], 1 }
  0x81   :  { %214 = vsyncpa [#allocation4], 1 }
  0x82   :  { %216 = vsyncpa [#allocation4 + $0x1], 1 }

// kernel: bottleneck_forward.1
= control target key start
LH: loop header
LB: loop body
LE: loop exit
PB: predicated region body
PF: predicated region fallthrough
CT: control target
= control target key end

     0   :  { %14 = vsyncpa [#allocation5], 0  ;;  %s4941_s0 = inlined_call_operand.vmem [shape: f32[2,8,8,64], index: 0, kind: input, shape index: {}]   ;;  %s4942_s1 = inlined_call_operand.vmem [shape: bf16[64,128], index: 1, kind: input, shape index: {}]   ;;  %s4943_s2 = inlined_call_operand.vmem [shape: f32[1,128], index: 2, kind: input, shape index: {}]   ;;  %s4944_s3 = inlined_call_operand.hbm [shape: bf16[1152,128], index: 3, kind: input, shape index: {}]   ;;  %s4945_s4 = inlined_call_operand.vmem [shape: f32[1,128], index: 4, kind: input, shape index: {}]   ;;  %s4946_s5 = inlined_call_operand.vmem [shape: bf16[128,256], index: 5, kind: input, shape index: {}]   ;;  %s4947_s6 = inlined_call_operand.vmem [shape: f32[1,256], index: 6, kind: input, shape index: {}]   ;;  %s4948_s7 = inlined_call_operand.vmem [shape: bf16[64,256], index: 7, kind: input, shape index: {}]   ;;  %s4949_s8 = inlined_call_operand.vmem [shape: f32[1,256], index: 8, kind: input, shape index: {}]   ;;  %s4950_s9 = inlined_call_operand.hbm [shape: bf16[2,8,8,256], index: 9, kind: output, shape index: {}]  }
   0x1   :  { %15 = vsyncpa [#allocation6], 0 }
   0x2   :  { %17 = vsyncpa [#allocation6 + $0x1], 0  ;;  %s4352_s30 = smov 0   ;;  %s4354_s10 = smov 0  }
   0x3   :  { %s4356_s11 = smov 0   ;;  %s4358_s12 = smov 0  }
   0x4 LB: > { %s4373_s13 = sadd.s32 4294967295, %s4291_s12   ;;  %s3550_s14 = sadd.s32 4294967294, %s4291_s12   ;;  %s4291_s12 = sphi %s4358_s12, %s4966_s12   ;;  %s4287_s11 = sphi %s4356_s11, %s4965_s11   ;;  %s4283_s10 = sphi %s4354_s10, %s4964_s10   ;;  %s4279_s30 = sphi %s4352_s30, %s4963_s30  }
   0x5   : > { %s4377_s15 = sadd.s32 1, %s4291_s12   ;;  %s224_s16 = sadd.s32 1, %s4287_s11 }
   0x6   : > { %s221_s17 = ssub.s32 %s4291_s12, %s4377_s15  ;;  %p234_p0 = scmp.ne.s32.totalorder %s4287_s11, %s4283_s10 }
   0x7   : > { %p222_p1 = scmp.eq.s32.totalorder %s221_s17, 0  ;;  %p235_p2 = scmp.eq.s32.totalorder %s4373_s13, 1 }
   0x8   : > { %p240_p3 = scmp.ne.s32.totalorder %s4283_s10, %s4279_s30  ;;  %p241_p4 = scmp.eq.s32.totalorder %s3550_s14, 1 }
   0x9   : > { %s4388_s18 = scalar_select %p222_p1, %s4287_s11, %s224_s16  }
   0xa   : > { %p4390_p5 = por %p235_p2, %p234_p0  ;;  %p4394_p6 = por %p241_p4, %p240_p3 }
   0xb   : > { %p3551_p7 = scmp.ge.s32.totalorder %s4291_s12, 1  ;;  %p248_p8 = scmp.lt.s32.totalorder %s4291_s12, 3 }
   0xc   : > { %s4954_s19 = scalar_select %p4390_p5, 1, 0 }
   0xd   : > { %s4955_s20 = scalar_select %p4394_p6, 1, 0 }
   0xe   : > { %p4951_p9 = scmp.eq.s32.totalorder %s4373_s13, 0  ;;  %p4401_p10 = pnand %p3551_p7, %p248_p8 }
   0xf   : > { %s4293_s22 = smov [#allocation4]   ;;  %s4197_s27 = scalar_lea.hbm %s4944_s3, 9216 }
  0x10   : > { %s4956_s21 = scalar_select %p4401_p10, 1, 0 }
  0x11   : > { %s266_s23 = sshll.u32 %s4293_s22, 4  ;;  %p4034_p11 = pneg %p4401_p10  ;;  %s267_s23 = int_to_ptr.vmem [resolvable:$true] %s266_s23 }
  0x12   : > { %p4198_p13 = scmp.ne.s32.totalorder %s4944_s3, %s4197_s27  ;;  %p4204_p3 = scmp.lt.u32.totalorder %s4197_s27, %s4944_s3 }
  0x13   : > { %p4409_p12 = pnand %p4951_p9, %p4034_p11 }
  0x15   : > { %p4199_p0 = pneg %p4409_p12 }
  0x17   : > { %p4200_p1 = pnand %p4199_p0, %p4198_p13 }
  0x19   : > { %p4201_p2 = pneg %p4200_p1 }
  0x1b   : > { %p4206_p4 = pnand %p4204_p3, %p4201_p2 }
  0x1d   : > { %4209 = shalt.err (!%p4206_p4)
}
  0x1e   : > { %s4210_s17 = scalar_lea.vmem %s267_s23, 9216  ;;  %p4218_p9 = scmp.lt.s32.totalorder %s267_s23, %s267_s23 }
  0x1f   : > { %p4211_p7 = scmp.ne.s32.totalorder %s267_s23, %s4210_s17  ;;  %p4219_p6 = scmp.lt.s32.totalorder %s4210_s17, %s4210_s17 }
  0x21   : > { %p4213_p8 = pnand %p4211_p7, %p4199_p0  ;;  %p4220_p5 = por %p4219_p6, %p4218_p9 }
  0x23   : > { %p4214_p11 = pneg %p4213_p8 }
  0x25   : > { %p4221_p10 = pnand %p4220_p5, %p4214_p11 }
  0x27   : > { %4224 = shalt.err (!%p4221_p10)
}
  0x28   : > { %s4294_s22 = smov 64   ;;  %s4295_s25 = smov 4  }
  0x29   : > { %4037 = dma.hbm_to_vmem [thread:$0]  (!%p4409_p12), %s4944_s3, 9216, %s267_s23, [#allocation5], %s4294_s22, %s4294_s22, %s4295_s25  }
  0x2a   : > { %p4958_p13 = scmp.ne.s32.totalorder %s4956_s21, 0 }
  0x2b   : > { %p4959_p1 = scmp.eq.s32.totalorder (!%p4958_p13), %s4373_s13, 0 }
  0x2c   : > { %305 = sbr.rel (%p4958_p13) target bundleno = 970 (0x3ca), region = 56 }
  0x33   : > { %4270 = dma.done.wait (%p4959_p1), [#allocation5], 9216   ;;  %p4960_p0 = pmov %p4959_p1 }
  0x34   : > { %p341_p5 = scmp.lt.s32.totalorder %s4373_s13, 1  ;;  %v4085_v0 = vld [vmem:[%s4942_s1] sm:$0xff]   ;;  %v4086_v1 = vld [vmem:[%s4942_s1 + $0x8] sm:$0xff]   ;;  %v4087_v2 = vld [vmem:[%s4942_s1 + $0x10] sm:$0xff]   ;;  %vm398_vm0 = vcmask 523264   ;;  %v4296_v22 = vmov 0  }
  0x35   : > { %4272 = vsyncadd (%p4960_p0), [#allocation5], 4294958080  ;;  %3956 = vmatprep.subr.bf16.mxu0 %v4085_v0  ;;  %v4088_v6 = vld [vmem:[%s4942_s1 + $0x18] sm:$0xff]   ;;  %v4089_v16 = vld [vmem:[#allocation4 + $0x40] sm:$0xff]   ;;  %489 = vst [vmem:[#allocation2 + $0x8] sm:$0x11] %v4296_v22 }
  0x36   : > { %s342_s27 = scalar_select %p341_p5, %s4373_s13, 1  ;;  %3957 = vmatpush3.bf16.msra.mxu0 %v4085_v0  ;;  %v4091_v17 = vld [vmem:[#allocation4 + $0x1c0] sm:$0xff]   ;;  %3784 = vmatprep.subr.bf16.mxu1 %v4089_v16  ;;  %v4093_v20 = vld [vmem:[#allocation4 + $0x48] sm:$0xff]   ;;  %490 = vst [vmem:[#allocation2 + $0x10] sm:$0x11] %v4296_v22  ;;  %v4097_v25 = vld [vmem:[#allocation4 + $0x50] sm:$0xff]  }
  0x37   : > { %3958 = vmatprep.subr.bf16.mxu0 %v4086_v1  ;;  %v4090_v18 = vld [vmem:[#allocation4] sm:$0xff]   ;;  %v4095_v21 = vld [vmem:[#allocation4 + $0x1c8] sm:$0xff]   ;;  %491 = vst [vmem:[#allocation2 + $0x18] sm:$0x11] %v4296_v22  ;;  %492 = vst [vmem:[#allocation2 + $0x20] sm:$0x11] %v4296_v22 }
  0x38   : > { %s3766_s29 = sshll.u32 %s342_s27, 6  ;;  %v4092_v19 = vld [vmem:[#allocation4 + $0x180] sm:$0xff]   ;;  %3785 = vmatpush3.bf16.msra.mxu1 %v4090_v18  ;;  %488 = vst [vmem:[#allocation2] sm:$0x11] %v4296_v22  ;;  %493 = vst [vmem:[#allocation2 + $0x28] sm:$0x11] %v4296_v22 }
  0x39   : > { %s345_s22 = scalar_lea.vmem %s4941_s0, %s3766_s29  ;;  %494 = vst [vmem:[#allocation2 + $0x30] sm:$0x22] %v4296_v22  ;;  %495 = vst [vmem:[#allocation2 + $0x38] sm:$0x22] %v4296_v22  ;;  %v4094_v23 = vld [vmem:[#allocation4 + $0x8] sm:$0xff]   ;;  %3786 = vmatprep.subr.bf16.mxu1 %v4093_v20  ;;  %v4098_v26 = vld [vmem:[#allocation4 + $0x10] sm:$0xff]  }
  0x3a   : > { %v347_v3 = vld [vmem:[%s345_s22] sm:$0xff]  ;;  %v348_v4 = vld [vmem:[%s345_s22 + $0x8] sm:$0xff]  ;;  %3959 = vmatpush3.bf16.msra.mxu0 %v4086_v1  ;;  %v349_v7 = vld [vmem:[%s345_s22 + $0x10] sm:$0xff]  ;;  %496 = vst [vmem:[#allocation2 + $0x40] sm:$0x22] %v4296_v22  ;;  %s338_s25 = sand.u32 1, %s4283_s10  }
  0x3b   : > { %v4449_v5 = vpack.c.bf16 %v348_v4, %v347_v3  ;;  %3960 = vmatprep.subr.bf16.mxu0 %v4087_v2  ;;  %v350_v8 = vld [vmem:[%s345_s22 + $0x18] sm:$0xff]  ;;  %v351_v9 = vld [vmem:[%s345_s22 + $0x20] sm:$0xff]  ;;  %v352_v10 = vld [vmem:[%s345_s22 + $0x28] sm:$0xff]  ;;  %497 = vst [vmem:[#allocation2 + $0x48] sm:$0x22] %v4296_v22  ;;  %s3556_s26 = sshll.u32 %s338_s25, 6 }
  0x3c   : > { %v4456_v11 = vpack.c.bf16 %v350_v8, %v349_v7  ;;  %v4458_v12 = vpack.c.bf16 %v352_v10, %v351_v9  ;;  %v353_v13 = vld [vmem:[%s345_s22 + $0x30] sm:$0xff]  ;;  %v354_v14 = vld [vmem:[%s345_s22 + $0x38] sm:$0xff]  ;;  %498 = vst [vmem:[#allocation2 + $0x50] sm:$0x22] %v4296_v22  ;;  %499 = vst [vmem:[#allocation2 + $0x58] sm:$0x22] %v4296_v22  ;;  %3787 = vmatpush3.bf16.msra.mxu1 %v4094_v23 }
  0x3d   : > { %3964 = vmatprep.mubr.msk.bf16.mxu0 %vm398_vm0, %v4449_v5  ;;  %v4464_v15 = vpack.c.bf16 %v354_v14, %v353_v13  ;;  %500 = vst [vmem:[#allocation2] sm:$0xee] %v4296_v22  ;;  %501 = vst [vmem:[#allocation2 + $0x30] sm:$0x11] %v4296_v22  ;;  %v4096_v24 = vld [vmem:[#allocation4 + $0x188] sm:$0xff]   ;;  %v4099_v27 = vld [vmem:[#allocation4 + $0x1d0] sm:$0xff]   ;;  %3788 = vmatprep.subr.bf16.mxu1 %v4097_v25 }
  0x3e   : > { %3961 = vmatpush3.bf16.msra.mxu0 %v4087_v2  ;;  %502 = vst [vmem:[#allocation2 + $0x28] sm:$0xee] %v4296_v22  ;;  %503 = vst [vmem:[#allocation2 + $0x58] sm:$0x11] %v4296_v22  ;;  %v4100_v28 = vld [vmem:[#allocation4 + $0x190] sm:$0xff]   ;;  %v4101_v29 = vld [vmem:[#allocation4 + $0x58] sm:$0xff]  }
  0x3f   : > { %3962 = vmatprep.subr.bf16.mxu0 %v4088_v6  ;;  %v4103_v30 = vld [vmem:[#allocation4 + $0x1d8] sm:$0xff]   ;;  %v4105_v33 = vld [vmem:[#allocation4 + $0x60] sm:$0xff]   ;;  %v4109_v37 = vld [vmem:[#allocation4 + $0x68] sm:$0xff]   ;;  %s4856_s28 = scalar_lea.vmem [#allocation7], %s3556_s26  ;;  %s3775_s27 = sshll.u32 %s4373_s13, 10 }
  0x40   : > { %3789 = vmatpush3.bf16.msra.mxu1 %v4098_v26  ;;  %v4102_v31 = vld [vmem:[#allocation4 + $0x18] sm:$0xff]   ;;  %v4107_v34 = vld [vmem:[#allocation4 + $0x1e0] sm:$0xff]   ;;  %v4111_v38 = vld [vmem:[#allocation4 + $0x1e8] sm:$0xff]   ;;  %v550_v26 = vlaneseq  ;;  %s3476_s29 = sshll.u32 %s4856_s28, 4  ;;  %s4892_s16 = scalar_lea.hbm %s4950_s9, %s3775_s27  ;;  %s4894_s29 = int_to_ptr.vmem [resolvable:$true] %s3476_s29 }
  0x41   : > { %v4104_v32 = vld [vmem:[#allocation4 + $0x198] sm:$0xff]   ;;  %3790 = vmatprep.subr.bf16.mxu1 %v4101_v29  ;;  %v4106_v35 = vld [vmem:[#allocation4 + $0x20] sm:$0xff]   ;;  %v4110_v39 = vld [vmem:[#allocation4 + $0x28] sm:$0xff]   ;;  %s4900_s23 = scalar_lea.sflag [#allocation6], %s338_s25  ;;  %s4225_s13 = scalar_lea.vmem %s4894_s29, 1024 }
  0x42   : > { %3963 = vmatpush3.bf16.msra.mxu0 %v4088_v6  ;;  %v4108_v36 = vld [vmem:[#allocation4 + $0x1a0] sm:$0xff]   ;;  %v4112_v40 = vld [vmem:[#allocation4 + $0x1a8] sm:$0xff]   ;;  %v4113_v41 = vld [vmem:[#allocation4 + $0x70] sm:$0xff]   ;;  %p4226_p6 = scmp.ne.s32.totalorder %s4894_s29, %s4225_s13  ;;  %p4961_p9 = scmp.ne.s32.totalorder %s4954_s19, 0 }
  0x43   : > { %3904 = vmatprep.subr.bf16.mxu0 %v4091_v17  ;;  %v4115_v42 = vld [vmem:[#allocation4 + $0x1f0] sm:$0xff]   ;;  %v4117_v45 = vld [vmem:[#allocation4 + $0x78] sm:$0xff]   ;;  %v4121_v49 = vld [vmem:[#allocation4 + $0xc0] sm:$0xff]   ;;  %s4299_s21 = smov [#allocation7]  }
  0x44   : > { %3791 = vmatpush3.bf16.msra.mxu1 %v4102_v31  ;;  %v4114_v43 = vld [vmem:[#allocation4 + $0x30] sm:$0xff]   ;;  %v4119_v46 = vld [vmem:[#allocation4 + $0x1f8] sm:$0xff]   ;;  %v3559_v50 = vld [vmem:[%s4943_s2] ss:$0 sm:$0xff]  ;;  %p4227_p10 = pnand %p4226_p6, %p4961_p9  ;;  %s4229_s17 = sshll.u32 %s4299_s21, 4  ;;  %s4230_s17 = int_to_ptr.vmem [resolvable:$false] %s4229_s17 }
  0x45   : > { %3965 = vmatmul.mubr.msk.bf16.vlgmr.msra.gmra.mrb[0].mxu0 %vm398_vm0, %v4456_v11  ;;  %3792 = vmatprep.subr.bf16.mxu1 %v4105_v33  ;;  %v4116_v44 = vld [vmem:[#allocation4 + $0x1b0] sm:$0xff]   ;;  %v4118_v47 = vld [vmem:[#allocation4 + $0x38] sm:$0xff]   ;;  %s4231_s22 = scalar_lea.vmem %s4230_s17, 2048  ;;  %p4232_p2 = scmp.lt.s32.totalorder %s4894_s29, %s4230_s17 }
  0x46   : > { %3968 = vmatprep.mubr.msk.bf16.mxu0 %vm398_vm0, %v4458_v12  ;;  %3905 = vmatpush3.bf16.msra.mxu0 %v4092_v19  ;;  %v4120_v48 = vld [vmem:[#allocation4 + $0x1b8] sm:$0xff]   ;;  %p4228_p12 = pneg %p4227_p10  ;;  %p4233_p3 = scmp.lt.s32.totalorder %s4231_s22, %s4225_s13 }
  0x47   : > { %3906 = vmatprep.subr.bf16.mxu0 %v4095_v21 }
  0x48   : > { %3793 = vmatpush3.bf16.msra.mxu1 %v4106_v35  ;;  %p4234_p4 = por %p4233_p3, %p4232_p2 }
  0x49   : > { %3794 = vmatprep.subr.bf16.mxu1 %v4109_v37 }
  0x4a   : > { %3907 = vmatpush3.bf16.msra.mxu0 %v4096_v24  ;;  %v4297_v24 = vmov 1935823168   ;;  %p4235_p7 = pnand %p4234_p4, %p4228_p12 }
  0x4b   : > { %3908 = vmatprep.subr.bf16.mxu0 %v4099_v27  ;;  %v548_v25 = vunpack.c.l.s4 %v4297_v24 }
  0x4c   : > { %3795 = vmatpush3.bf16.msra.mxu1 %v4110_v39 }
  0x4d   : > { %3969 = vmatmul.mubr.msk.bf16.gmra.mrb[4].mxu0 %vm398_vm0, %v4464_v15  ;;  %3796 = vmatprep.subr.bf16.mxu1 %v4113_v41  ;;  %v549_v33 = vunpack.c.0.s8 %v548_v25 }
  0x4e   : > { %3909 = vmatpush3.bf16.msra.mxu0 %v4100_v28 }
  0x4f   : > { %3910 = vmatprep.subr.bf16.mxu0 %v4103_v30 }
  0x50   : > { %3797 = vmatpush3.bf16.msra.mxu1 %v4114_v43 }
  0x51   : > { %3798 = vmatprep.subr.bf16.mxu1 %v4117_v45 }
  0x52   : > { %3911 = vmatpush3.bf16.msra.mxu0 %v4104_v32 }
  0x53   : > { %3912 = vmatprep.subr.bf16.mxu0 %v4107_v34  ;;  %v4487_v34 = vshrl.u32 %v550_v26, 7 }
  0x54   : > { %3799 = vmatpush3.bf16.msra.mxu1 %v4118_v47 }
  0x55   : > { %3824 = vmatprep.subr.bf16.mxu1 %v4121_v49 }
  0x56   : > { %3913 = vmatpush3.bf16.msra.mxu0 %v4108_v36 }
  0x57   : > { %3914 = vmatprep.subr.bf16.mxu0 %v4111_v38 }
  0x5a   : > { %3915 = vmatpush3.bf16.msra.mxu0 %v4112_v40 }
  0x5b   : > { %3916 = vmatprep.subr.bf16.mxu0 %v4115_v42  ;;  %v552_v42 = vsub.s32 %v549_v33, %v4487_v34 }
  0x5e   : > { %3917 = vmatpush3.bf16.msra.mxu0 %v4116_v44 }
  0x5f   : > { %3918 = vmatprep.subr.bf16.mxu0 %v4119_v46 }
  0x62   : > { %3919 = vmatpush3.bf16.msra.mxu0 %v4120_v48 }
 0x118   : > { %v3966_v51 = vpop.f32.mrb[0].mxu0 }
 0x119   : > { %v454_v52 = vadd.f32 %v3966_v51, %v3559_v50  ;;  %v445_v53 = vpop.f32.mrb[1].mxu0 }
 0x11a   : > { %v446_v54 = vadd.f32 %v3559_v50, %v445_v53  ;;  %v3967_v55 = vpop.f32.mrb[2].mxu0 }
 0x11b   : > { %v457_v56 = vadd.f32 %v3967_v55, %v3559_v50  ;;  %v448_v57 = vpop.f32.mrb[3].mxu0  ;;  %v478_v59 = vmax.f32 %v454_v52, 0.0 }
 0x11c   : > { %v449_v58 = vadd.f32 %v3559_v50, %v448_v57  ;;  %v476_v61 = vmax.f32 %v446_v54, 0.0  ;;  %v4298_v54 = vmov 1966171168  }
 0x11d   : > { %v479_v60 = vmax.f32 %v457_v56, 0.0  ;;  %v709_v55 = vunpack.c.l.s4 %v4298_v54 }
 0x11e   : > { %v477_v62 = vmax.f32 %v449_v58, 0.0 }
 0x11f   : > { %v485_v63 = vpack.c.bf16 %v479_v60, %v478_v59 }
 0x120   : > { %v484_v0 = vpack.c.bf16 %v477_v62, %v476_v61  ;;  %v3970_v1 = vpop.f32.mrb[4].mxu0 }
 0x121   : > { %v516_v2 = vunpack.i.h.s16 %v485_v63  ;;  %v470_v3 = vadd.f32 %v3970_v1, %v3559_v50  ;;  %v461_v4 = vpop.f32.mrb[5].mxu0 }
 0x122   : > { %v506_v6 = vunpack.i.h.s16 %v484_v0  ;;  %v462_v7 = vadd.f32 %v3559_v50, %v461_v4  ;;  %v3971_v8 = vpop.f32.mrb[6].mxu0  ;;  %v3632_v4 = vld.sshfl [vmem:[#allocation2 + $0x30] sm:$0x55 pattern:$0x75316420] }
 0x123   : > { %v3571_v9 = vpack.c.b16 %v516_v2, %v485_v63  ;;  %v473_v10 = vadd.f32 %v3971_v8, %v3559_v50  ;;  %v464_v13 = vpop.f32.mrb[7].mxu0  ;;  %v482_v16 = vmax.f32 %v470_v3, 0.0  ;;  %v710_v2 = vunpack.c.0.s8 %v709_v55  ;;  %v3592_v3 = vld.sshfl [vmem:[#allocation2] sm:$0xff pattern:$0x75316420] }
 0x124   : > { %v465_v14 = vadd.f32 %v3559_v50, %v464_v13  ;;  %v3568_v19 = vpack.c.b16 %v506_v6, %v484_v0  ;;  %v480_v20 = vmax.f32 %v462_v7, 0.0  ;;  %v4493_v7 = vld.sshfl [vmem:[#allocation2] sm:$0xaa pattern:$0x75316420] }
 0x125   : > { %v483_v17 = vmax.f32 %v473_v10, 0.0  ;;  %v519_v18 = vunpack.i.h.s16 %v3571_v9  ;;  %v4491_v6 = vsub.s32 %v710_v2, %v4487_v34 }
 0x126   : > { %v481_v21 = vmax.f32 %v465_v14, 0.0  ;;  %v509_v30 = vunpack.i.h.s16 %v3568_v19 }
 0x127   : > { %v487_v23 = vpack.c.bf16 %v483_v17, %v482_v16  ;;  %v3572_v29 = vpack.c.b16 %v519_v18, %v3571_v9 }
 0x128   : > { %v486_v27 = vpack.c.bf16 %v481_v21, %v480_v20  ;;  %v3569_v38 = vpack.c.b16 %v509_v30, %v3568_v19 }
 0x129   : > { %v536_v28 = vunpack.i.h.s16 %v487_v23  ;;  %v522_v37 = vunpack.i.h.s16 %v3572_v29  ;;  %v3580_v41 = vpack.c.b16 %v3572_v29, %v3572_v29 }
 0x12a   : > { %v526_v31 = vunpack.i.h.s16 %v486_v27  ;;  %v512_v46 = vunpack.i.h.s16 %v3569_v38 }
 0x12b   : > { %v3577_v32 = vpack.c.b16 %v536_v28, %v487_v23  ;;  %v3573_v45 = vpack.c.b16 %v522_v37, %v3572_v29  ;;  %v553_v51 = vrot.slane %v3580_v41, %v552_v42 }
 0x12c   : > { %v3574_v35 = vpack.c.b16 %v526_v31, %v486_v27 }
 0x12d   : > { %v539_v36 = vunpack.i.h.s16 %v3577_v32  ;;  %v567_v58 = vrot.slane %v3573_v45, %v552_v42 }
 0x12e   : > { %v529_v39 = vunpack.i.h.s16 %v3574_v35 }
 0x12f   : > { %v3578_v40 = vpack.c.b16 %v539_v36, %v3577_v32 }
 0x130   : > { %v3575_v43 = vpack.c.b16 %v529_v39, %v3574_v35 }
 0x131   : > { %v542_v44 = vunpack.i.h.s16 %v3578_v40 }
 0x132   : > { %v532_v47 = vunpack.i.h.s16 %v3575_v43  ;;  %v3581_v48 = vpack.c.b16 %v3575_v43, %v3569_v38 }
 0x133   : > { %v3579_v49 = vpack.c.b16 %v542_v44, %v3578_v40  ;;  %v3583_v50 = vpack.c.b16 %v542_v44, %v542_v44 }
 0x134   : > { %v3582_v52 = vpack.c.b16 %v532_v47, %v512_v46  ;;  %v560_v53 = vrot.slane %v3581_v48, %v552_v42 }
 0x135   : > { %v614_v56 = vrot.slane %v3579_v49, %v552_v42  ;;  %v621_v57 = vrot.slane %v3583_v50, %v552_v42 }
 0x136   : > { %v574_v59 = vrot.slane %v3582_v52, %v552_v42  ;;  %v575_v60 = vcombine.low %v553_v51, %v560_v53  ;;  %v576_v61 = vcombine.high %v553_v51, %v560_v53 }
 0x137   : > { %v622_v62 = vcombine.high %v614_v56, %v614_v56  ;;  %v623_v63 = vcombine.high %v621_v57, %v621_v57  ;;  %3588 = vst.sshfl [vmem:[#allocation2 + $0x38] sm:$0x5 pattern:$0x75316420] %v614_v56 }
 0x138   : > { %3590 = vst.sshfl [vmem:[#allocation2 + $0x48] sm:$0x5 pattern:$0x75316420] %v621_v57  ;;  %v577_v0 = vcombine.low %v567_v58, %v574_v59  ;;  %v578_v1 = vcombine.high %v567_v58, %v574_v59 }
 0x139   : > { %3584 = vst.sshfl [vmem:[#allocation2 + $0x8] sm:$0xfa pattern:$0x75316420] %v575_v60 }
 0x13a   : > { %3585 = vst.sshfl [vmem:[#allocation2 + $0x10] sm:$0xfa pattern:$0x75316420] %v576_v61 }
 0x13b   : > { %3589 = vst.sshfl [vmem:[#allocation2 + $0x40] sm:$0x5 pattern:$0x75316420] %v622_v62 }
 0x13c   : > { %3591 = vst.sshfl [vmem:[#allocation2 + $0x50] sm:$0x5 pattern:$0x75316420] %v623_v63 }
 0x13d   : > { %3586 = vst.sshfl [vmem:[#allocation2 + $0x18] sm:$0xfa pattern:$0x75316420] %v577_v0 }
 0x13e   : > { %3587 = vst.sshfl [vmem:[#allocation2 + $0x20] sm:$0xfa pattern:$0x75316420] %v578_v1 }
 0x13f   : > { %v4495_v8 = vld.sshfl [vmem:[#allocation2 + $0x38] sm:$0x55 pattern:$0x75316420] }
 0x140   : > { %v3596_v9 = vld.sshfl [vmem:[#allocation2 + $0x8] sm:$0xff pattern:$0x75316420]  ;;  %v1626_v13 = vcombine.low %v3632_v4, %v4495_v8  ;;  %v1627_v14 = vcombine.high %v3632_v4, %v4495_v8 }
 0x141   : > { %v4497_v10 = vld.sshfl [vmem:[#allocation2 + $0x10] sm:$0xff pattern:$0x75316420]  ;;  %v704_v19 = vcombine.low %v3592_v3, %v3596_v9  ;;  %v705_v20 = vcombine.high %v3592_v3, %v3596_v9 }
 0x142   : > { %v820_v16 = vcombine.low %v3596_v9, %v4497_v10  ;;  %v821_v17 = vcombine.high %v3596_v9, %v4497_v10  ;;  %v4503_v18 = vld.sshfl [vmem:[#allocation2 + $0x8] sm:$0xaa pattern:$0x75316420]  ;;  %v4512_v26 = vrot.slane %v1626_v13, %v4491_v6  ;;  %v4515_v27 = vrot.slane %v1627_v14, %v4491_v6 }
 0x143   : > { %v1564_v24 = vcombine.low %v4493_v7, %v4503_v18  ;;  %v1565_v25 = vcombine.high %v4493_v7, %v4503_v18  ;;  %v4522_v31 = vld.sshfl [vmem:[#allocation2 + $0x10] sm:$0xaa pattern:$0x75316420]  ;;  %v4530_v36 = vrot.slane %v704_v19, %v4491_v6  ;;  %v4564_v3 = vrot.slane %v705_v20, %v4491_v6 }
 0x144   : > { %v3598_v21 = vld.sshfl [vmem:[#allocation2 + $0x18] sm:$0xff pattern:$0x75316420]  ;;  %v4520_v30 = vrot.slane %v820_v16, %v4491_v6  ;;  %v1748_v35 = vcombine.low %v4503_v18, %v4522_v31  ;;  %v4534_v38 = vrot.slane %v821_v17, %v4491_v6  ;;  %v1749_v46 = vcombine.high %v4503_v18, %v4522_v31 }
 0x145   : > { %v4505_v23 = vld.sshfl [vmem:[#allocation2 + $0x20] sm:$0xff pattern:$0x75316420]  ;;  %v706_v32 = vcombine.low %v4497_v10, %v3598_v21  ;;  %v1574_v37 = vrot.slane %v1564_v24, %v4491_v6  ;;  %v707_v55 = vcombine.high %v4497_v10, %v3598_v21 }
 0x146   : > { %v822_v28 = vcombine.low %v3598_v21, %v4505_v23  ;;  %v823_v29 = vcombine.high %v3598_v21, %v4505_v23  ;;  %v4525_v33 = vld.sshfl [vmem:[#allocation2 + $0x18] sm:$0xaa pattern:$0x75316420]  ;;  %v1758_v45 = vrot.slane %v1748_v35, %v4491_v6  ;;  %v1765_v53 = vrot.slane %v1749_v46, %v4491_v6 }
 0x147   : > { %v3639_v40 = vld.sshfl [vmem:[#allocation2 + $0x20] sm:$0xaa pattern:$0x75316420]  ;;  %v4540_v41 = vrot.slane %v706_v32, %v4491_v6  ;;  %v1566_v42 = vcombine.low %v4522_v31, %v4525_v33 }
 0x148   : > { %v4537_v39 = vrot.slane %v822_v28, %v4491_v6  ;;  %v4545_v43 = vrot.slane %v823_v29, %v4491_v6  ;;  %v1750_v44 = vcombine.low %v4525_v33, %v3639_v40  ;;  %v1751_v47 = vcombine.high %v4525_v33, %v3639_v40 }
 0x149   : > { %v736_v49 = vcombine.low %v4530_v36, %v4540_v41  ;;  %v1588_v50 = vrot.slane %v1566_v42, %v4491_v6  ;;  %v4567_v40 = vrot.slane %v707_v55, %v4491_v6 }
 0x14a   : > { %v852_v48 = vcombine.low %v4520_v30, %v4537_v39  ;;  %v854_v51 = vcombine.low %v4534_v38, %v4545_v43  ;;  %v1772_v52 = vrot.slane %v1750_v44, %v4491_v6  ;;  %v1779_v54 = vrot.slane %v1751_v47, %v4491_v6 }
 0x14b   : > { %v740_v58 = vunpack.c.l.b16 %v736_v49  ;;  %v741_v59 = vunpack.c.h.b16 %v736_v49  ;;  %v1596_v61 = vcombine.high %v1574_v37, %v1588_v50  ;;  %v738_v55 = vcombine.low %v4564_v3, %v4567_v40 }
 0x14c   : > { %v856_v56 = vunpack.c.l.b16 %v852_v48  ;;  %v857_v57 = vunpack.c.h.b16 %v852_v48  ;;  %v1780_v60 = vcombine.high %v1758_v45, %v1772_v52  ;;  %v866_v62 = vunpack.c.l.b16 %v854_v51 }
 0x14d   : > { %v867_v63 = vunpack.c.h.b16 %v854_v51  ;;  %v742_v1 = vpack.i.b16 %v741_v59, %v740_v58  ;;  %v1781_v2 = vcombine.high %v1765_v53, %v1779_v54  ;;  %v1660_v13 = vunpack.c.l.b16 %v1596_v61 }
 0x14e   : > { %v858_v0 = vpack.i.b16 %v857_v57, %v856_v56  ;;  %v1844_v4 = vunpack.c.l.b16 %v1780_v60  ;;  %v1845_v9 = vunpack.c.h.b16 %v1780_v60  ;;  %v1661_v14 = vunpack.c.h.b16 %v1596_v61  ;;  %v4122_v57 = vld [vmem:[#allocation4 + $0x80] sm:$0xff]  }
 0x14f   : > { %v743_v17 = vunpack.c.l.b16 %v742_v1  ;;  %v744_v19 = vunpack.c.h.b16 %v742_v1  ;;  %v868_v28 = vpack.i.b16 %v867_v63, %v866_v62  ;;  %v1854_v29 = vunpack.c.l.b16 %v1781_v2  ;;  %v4123_v63 = vld [vmem:[#allocation4 + $0xc8] sm:$0xff]  }
 0x150   : > { %v859_v16 = vunpack.c.l.b16 %v858_v0  ;;  %v860_v10 = vunpack.c.h.b16 %v858_v0  ;;  %v1846_v21 = vpack.i.b16 %v1845_v9, %v1844_v4  ;;  %v1662_v24 = vpack.i.b16 %v1661_v14, %v1660_v13 }
 0x151   : > { %v745_v35 = vpack.i.b16 %v744_v19, %v743_v17  ;;  %v1855_v37 = vunpack.c.h.b16 %v1781_v2  ;;  %v869_v52 = vunpack.c.l.b16 %v868_v28  ;;  %v870_v53 = vunpack.c.h.b16 %v868_v28 }
 0x152   : > { %v861_v32 = vpack.i.b16 %v860_v10, %v859_v16  ;;  %v1847_v20 = vunpack.c.l.b16 %v1846_v21  ;;  %v1848_v42 = vunpack.c.h.b16 %v1846_v21  ;;  %v1663_v44 = vunpack.c.l.b16 %v1662_v24  ;;  %v4573_v10 = vld.sshfl [vmem:[#allocation2 + $0x40] sm:$0x55 pattern:$0x75316420] }
 0x153   : > { %v1664_v45 = vunpack.c.h.b16 %v1662_v24  ;;  %v746_v48 = vunpack.c.l.b16 %v745_v35  ;;  %v747_v49 = vunpack.c.h.b16 %v745_v35  ;;  %v1856_v58 = vpack.i.b16 %v1855_v37, %v1854_v29  ;;  %v4124_v24 = vld [vmem:[#allocation4 + $0x88] sm:$0xff]   ;;  %v4125_v29 = vld [vmem:[#allocation4 + $0xd0] sm:$0xff]  }
 0x154   : > { %v862_v46 = vunpack.c.l.b16 %v861_v32  ;;  %v863_v47 = vunpack.c.h.b16 %v861_v32  ;;  %v1849_v50 = vpack.i.b16 %v1848_v42, %v1847_v20  ;;  %v871_v0 = vpack.i.b16 %v870_v53, %v869_v52  ;;  %v4127_v53 = vld [vmem:[#allocation4 + $0xd8] sm:$0xff]  }
 0x155   : > { %v1665_v51 = vpack.i.b16 %v1664_v45, %v1663_v44  ;;  %v748_v56 = vpack.i.b16 %v747_v49, %v746_v48  ;;  %v1857_v1 = vunpack.c.l.b16 %v1856_v58  ;;  %v1858_v2 = vunpack.c.h.b16 %v1856_v58  ;;  %v4126_v48 = vld [vmem:[#allocation4 + $0x90] sm:$0xff]  }
 0x156   : > { %v864_v54 = vpack.i.b16 %v863_v47, %v862_v46  ;;  %v1850_v59 = vunpack.c.l.b16 %v1849_v50  ;;  %v1851_v60 = vunpack.c.h.b16 %v1849_v50  ;;  %v750_v4 = vunpack.c.l.b16 %v738_v55  ;;  %v4586_v46 = vld.sshfl [vmem:[#allocation2 + $0x48] sm:$0x55 pattern:$0x75316420] }
 0x157   : > { %v1666_v61 = vunpack.c.l.b16 %v1665_v51  ;;  %v1667_v62 = vunpack.c.h.b16 %v1665_v51  ;;  %v751_v14 = vunpack.c.h.b16 %v738_v55  ;;  %v1567_v16 = vcombine.high %v4522_v31, %v4525_v33  ;;  %v4582_v33 = vld.sshfl [vmem:[#allocation2 + $0x50] sm:$0x55 pattern:$0x75316420] }
 0x158   : > { %2723 = vmatprep.mubr.bf16.mxu1 %v864_v54  ;;  %v1852_v9 = vpack.i.b16 %v1851_v60, %v1850_v59  ;;  %v872_v17 = vunpack.c.l.b16 %v871_v0  ;;  %v873_v19 = vunpack.c.h.b16 %v871_v0  ;;  %v1859_v21 = vpack.i.b16 %v1858_v2, %v1857_v1  ;;  %v4128_v2 = vld [vmem:[#allocation4 + $0x98] sm:$0xff]  }
 0x159   : > { %2724 = vmatmul.mubr.bf16.vlgmr.msra.gmra.mrb[0].mxu1 %v748_v56  ;;  %v1668_v13 = vpack.i.b16 %v1667_v62, %v1666_v61  ;;  %v1581_v28 = vrot.slane %v1565_v25, %v4491_v6  ;;  %v752_v32 = vpack.i.b16 %v751_v14, %v750_v4  ;;  %v1595_v35 = vrot.slane %v1567_v16, %v4491_v6  ;;  %v4129_v14 = vld [vmem:[#allocation4 + $0xe0] sm:$0xff]  }
 0x15a   : > { %3825 = vmatpush3.bf16.msra.mxu1 %v4122_v57  ;;  %2918 = vmatprep.mubr.bf16.mxu0 %v1852_v9  ;;  %v853_v31 = vcombine.high %v4520_v30, %v4537_v39  ;;  %v874_v37 = vpack.i.b16 %v873_v19, %v872_v17  ;;  %v1860_v20 = vunpack.c.l.b16 %v1859_v21  ;;  %v1861_v42 = vunpack.c.h.b16 %v1859_v21 }
 0x15b   : > { %3826 = vmatprep.subr.bf16.mxu1 %v4123_v63  ;;  %2919 = vmatmul.mubr.bf16.vlgmr.msra.gmra.mrb[8].mxu0 %v1668_v13  ;;  %v1810_v44 = vcombine.low %v4495_v8, %v4573_v10  ;;  %v753_v7 = vunpack.c.l.b16 %v752_v32  ;;  %v754_v18 = vunpack.c.h.b16 %v752_v32  ;;  %v1597_v25 = vcombine.high %v1581_v28, %v1595_v35 }
 0x15c   : > { %v876_v45 = vunpack.c.l.b16 %v853_v31  ;;  %2731 = vmatprep.mubr.bf16.mxu1 %v874_v37  ;;  %v1862_v47 = vpack.i.b16 %v1861_v42, %v1860_v20  ;;  %v877_v30 = vunpack.c.h.b16 %v853_v31  ;;  %v1812_v39 = vcombine.low %v4586_v46, %v4582_v33  ;;  %v4130_v20 = vld [vmem:[#allocation4 + $0xa0] sm:$0xff]  }
 0x15d   : > { %v1820_v49 = vrot.slane %v1810_v44, %v4491_v6  ;;  %v755_v50 = vpack.i.b16 %v754_v18, %v753_v7  ;;  %v1670_v51 = vunpack.c.l.b16 %v1597_v25  ;;  %v1671_v52 = vunpack.c.h.b16 %v1597_v25  ;;  %v4131_v25 = vld [vmem:[#allocation4 + $0xe8] sm:$0xff]  }
 0x15e   : > { %3827 = vmatpush3.bf16.msra.mxu1 %v4124_v24  ;;  %v737_v54 = vcombine.high %v4530_v36, %v4540_v41  ;;  %2926 = vmatprep.mubr.bf16.mxu0 %v1862_v47  ;;  %v878_v56 = vpack.i.b16 %v877_v30, %v876_v45  ;;  %v1834_v57 = vrot.slane %v1812_v39, %v4491_v6 }
 0x15f   : > { %3828 = vmatprep.subr.bf16.mxu1 %v4125_v29  ;;  %v1628_v58 = vcombine.low %v4573_v10, %v4586_v46  ;;  %v855_v55 = vcombine.high %v4534_v38, %v4545_v43  ;;  %v756_v59 = vunpack.c.l.b16 %v755_v50  ;;  %v757_v60 = vunpack.c.h.b16 %v755_v50 }
 0x160   : > { %v1672_v61 = vpack.i.b16 %v1671_v52, %v1670_v51  ;;  %v760_v62 = vunpack.c.l.b16 %v737_v54  ;;  %v879_v63 = vunpack.c.l.b16 %v878_v56  ;;  %v880_v0 = vunpack.c.h.b16 %v878_v56 }
 0x161   : > { %v1842_v1 = vcombine.low %v1820_v49, %v1834_v57  ;;  %v761_v36 = vunpack.c.h.b16 %v737_v54  ;;  %v758_v4 = vpack.i.b16 %v757_v60, %v756_v59  ;;  %v1650_v16 = vrot.slane %v1628_v58, %v4491_v6  ;;  %v4132_v54 = vld [vmem:[#allocation4 + $0xa8] sm:$0xff]   ;;  %v4133_v59 = vld [vmem:[#allocation4 + $0xf0] sm:$0xff]   ;;  %v4604_v60 = vld.sshfl [vmem:[#allocation2] sm:$0xfa pattern:$0x75316420] }
 0x162   : > { %3829 = vmatpush3.bf16.msra.mxu1 %v4126_v48  ;;  %v1673_v9 = vunpack.c.l.b16 %v1672_v61  ;;  %v1674_v13 = vunpack.c.h.b16 %v1672_v61  ;;  %v881_v17 = vpack.i.b16 %v880_v0, %v879_v63  ;;  %v886_v28 = vunpack.c.l.b16 %v855_v55  ;;  %v4606_v0 = vld.sshfl [vmem:[#allocation2 + $0x8] sm:$0xfa pattern:$0x75316420] }
 0x163   : > { %3830 = vmatprep.subr.bf16.mxu1 %v4127_v53  ;;  %v1864_v19 = vunpack.c.l.b16 %v1842_v1  ;;  %v1865_v38 = vunpack.c.h.b16 %v1842_v1  ;;  %v762_v43 = vpack.i.b16 %v761_v36, %v760_v62  ;;  %2732 = vmatmul.mubr.bf16.gmra.mrb[4].mxu1 %v758_v4  ;;  %v1658_v24 = vcombine.low %v4512_v26, %v1650_v16 }
 0x164   : > { %v1675_v21 = vpack.i.b16 %v1674_v13, %v1673_v9  ;;  %v887_v29 = vunpack.c.h.b16 %v855_v55  ;;  %v882_v32 = vunpack.c.l.b16 %v881_v17  ;;  %v883_v35 = vunpack.c.h.b16 %v881_v17 }
 0x165   : > { %v1866_v31 = vpack.i.b16 %v1865_v38, %v1864_v19  ;;  %v763_v37 = vunpack.c.l.b16 %v762_v43  ;;  %v764_v7 = vunpack.c.h.b16 %v762_v43  ;;  %v1680_v18 = vunpack.c.l.b16 %v1658_v24  ;;  %v4614_v43 = vld.sshfl [vmem:[#allocation2 + $0x18] sm:$0xfa pattern:$0x75316420] }
 0x166   : > { %3831 = vmatpush3.bf16.msra.mxu1 %v4128_v2  ;;  %v1676_v42 = vunpack.c.l.b16 %v1675_v21  ;;  %v1677_v44 = vunpack.c.h.b16 %v1675_v21  ;;  %v884_v45 = vpack.i.b16 %v883_v35, %v882_v32  ;;  %v1681_v30 = vunpack.c.h.b16 %v1658_v24  ;;  %v4135_v24 = vld [vmem:[#allocation4 + $0xf8] sm:$0xff]   ;;  %v3603_v35 = vld.sshfl [vmem:[#allocation2 + $0x28] sm:$0xff pattern:$0x75316420] }
 0x167   : > { %3832 = vmatprep.subr.bf16.mxu1 %v4129_v14  ;;  %v1867_v47 = vunpack.c.l.b16 %v1866_v31  ;;  %v1868_v48 = vunpack.c.h.b16 %v1866_v31  ;;  %v765_v26 = vpack.i.b16 %v764_v7, %v763_v37  ;;  %v888_v49 = vpack.i.b16 %v887_v29, %v886_v28  ;;  %v4134_v14 = vld [vmem:[#allocation4 + $0xb0] sm:$0xff]  }
 0x168   : > { %v1678_v39 = vpack.i.b16 %v1677_v44, %v1676_v42  ;;  %v1811_v50 = vcombine.high %v4495_v8, %v4573_v10  ;;  %2739 = vmatprep.mubr.bf16.mxu1 %v884_v45  ;;  %v1682_v52 = vpack.i.b16 %v1681_v30, %v1680_v18  ;;  %v1813_v53 = vcombine.high %v4586_v46, %v4582_v33 }
 0x169   : > { %v1869_v51 = vpack.i.b16 %v1868_v48, %v1867_v47  ;;  %v766_v56 = vunpack.c.l.b16 %v765_v26  ;;  %v767_v57 = vunpack.c.h.b16 %v765_v26  ;;  %v889_v58 = vunpack.c.l.b16 %v888_v49  ;;  %v4137_v48 = vld [vmem:[#allocation4 + $0x140] sm:$0xff]  }
 0x16a   : > { %3833 = vmatpush3.bf16.msra.mxu1 %v4130_v20  ;;  %2927 = vmatmul.mubr.bf16.gmra.mrb[12].mxu0 %v1678_v39  ;;  %v890_v55 = vunpack.c.h.b16 %v888_v49  ;;  %v1683_v8 = vunpack.c.l.b16 %v1682_v52  ;;  %v1684_v63 = vunpack.c.h.b16 %v1682_v52  ;;  %v1827_v33 = vrot.slane %v1811_v50, %v4491_v6  ;;  %v4619_v20 = vld.sshfl [vmem:[#allocation2 + $0x10] sm:$0xfa pattern:$0x75316420] }
 0x16b   : > { %3834 = vmatprep.subr.bf16.mxu1 %v4131_v25  ;;  %v1870_v61 = vunpack.c.l.b16 %v1869_v51  ;;  %v1871_v62 = vunpack.c.h.b16 %v1869_v51  ;;  %v768_v1 = vpack.i.b16 %v767_v57, %v766_v56  ;;  %v1841_v36 = vrot.slane %v1813_v53, %v4491_v6  ;;  %v4136_v25 = vld [vmem:[#allocation4 + $0xb8] sm:$0xff]  }
 0x16c   : > { %v891_v2 = vpack.i.b16 %v890_v55, %v889_v58  ;;  %v1685_v9 = vpack.i.b16 %v1684_v63, %v1683_v8  ;;  %v739_v13 = vcombine.high %v4564_v3, %v4567_v40  ;;  %v1629_v16 = vcombine.high %v4573_v10, %v4586_v46 }
 0x16d   : > { %v1872_v4 = vpack.i.b16 %v1871_v62, %v1870_v61  ;;  %2740 = vmatmul.mubr.bf16.gmra.mrb[8].mxu1 %v768_v1  ;;  %v1843_v38 = vcombine.low %v1827_v33, %v1841_v36  ;;  %v1061_v21 = vcombine.high %v4604_v60, %v4606_v0  ;;  %v1063_v7 = vcombine.high %v4619_v20, %v4614_v43 }
 0x16e   : > { %3835 = vmatpush3.bf16.msra.mxu1 %v4132_v54  ;;  %v892_v17 = vunpack.c.l.b16 %v891_v2  ;;  %v893_v19 = vunpack.c.h.b16 %v891_v2  ;;  %v1686_v28 = vunpack.c.l.b16 %v1685_v9  ;;  %v1687_v29 = vunpack.c.h.b16 %v1685_v9 }
 0x16f   : > { %3836 = vmatprep.subr.bf16.mxu1 %v4133_v59  ;;  %2934 = vmatprep.mubr.bf16.mxu0 %v1872_v4  ;;  %v770_v32 = vunpack.c.l.b16 %v739_v13  ;;  %v771_v3 = vunpack.c.h.b16 %v739_v13  ;;  %v1874_v37 = vunpack.c.l.b16 %v1843_v38  ;;  %v1875_v10 = vunpack.c.h.b16 %v1843_v38 }
 0x170   : > { %v894_v31 = vpack.i.b16 %v893_v19, %v892_v17  ;;  %v1657_v46 = vrot.slane %v1629_v16, %v4491_v6  ;;  %v1688_v42 = vpack.i.b16 %v1687_v29, %v1686_v28  ;;  %v1077_v18 = vrot.slane %v1061_v21, %v4491_v6 }
 0x171   : > { %v772_v44 = vpack.i.b16 %v771_v3, %v770_v32  ;;  %v1876_v45 = vpack.i.b16 %v1875_v10, %v1874_v37  ;;  %v938_v30 = vcombine.low %v4505_v23, %v3603_v35  ;;  %v4627_v49 = vrot.slane %v1063_v7, %v4491_v6  ;;  %v3608_v37 = vld.sshfl [vmem:[#allocation2 + $0x30] sm:$0x5 pattern:$0x75316420] }
 0x172   : > { %3837 = vmatpush3.bf16.msra.mxu1 %v4134_v14  ;;  %2747 = vmatprep.mubr.bf16.mxu1 %v894_v31  ;;  %v1659_v47 = vcombine.low %v4515_v27, %v1657_v46  ;;  %v1060_v50 = vcombine.low %v4604_v60, %v4606_v0  ;;  %v1062_v58 = vcombine.low %v4619_v20, %v4614_v43  ;;  %v4648_v7 = vld.sshfl [vmem:[#allocation2 + $0x38] sm:$0x5 pattern:$0x75316420] }
 0x173   : > { %3838 = vmatprep.subr.bf16.mxu1 %v4135_v24  ;;  %2935 = vmatmul.mubr.bf16.gmra.mrb[16].mxu0 %v1688_v42  ;;  %v773_v39 = vunpack.c.l.b16 %v772_v44  ;;  %v774_v26 = vunpack.c.h.b16 %v772_v44  ;;  %v1877_v51 = vunpack.c.l.b16 %v1876_v45  ;;  %v1878_v52 = vunpack.c.h.b16 %v1876_v45 }
 0x174   : > { %v1690_v53 = vunpack.c.l.b16 %v1659_v47  ;;  %v1691_v54 = vunpack.c.h.b16 %v1659_v47  ;;  %v1093_v27 = vcombine.low %v1077_v18, %v4627_v49  ;;  %v960_v57 = vrot.slane %v938_v30, %v4491_v6 }
 0x175   : > { %v775_v56 = vpack.i.b16 %v774_v26, %v773_v39  ;;  %v1879_v55 = vpack.i.b16 %v1878_v52, %v1877_v51  ;;  %v1070_v61 = vrot.slane %v1060_v50, %v4491_v6  ;;  %v939_v60 = vcombine.high %v4505_v23, %v3603_v35 }
 0x176   : > { %3839 = vmatpush3.bf16.msra.mxu1 %v4136_v25  ;;  %v1692_v59 = vpack.i.b16 %v1691_v54, %v1690_v53  ;;  %v1140_v63 = vunpack.c.l.b16 %v1093_v27  ;;  %v1141_v1 = vunpack.c.h.b16 %v1093_v27  ;;  %v968_v14 = vcombine.low %v4540_v41, %v960_v57 }
 0x177   : > { %3864 = vmatprep.subr.bf16.mxu1 %v4137_v48  ;;  %v776_v62 = vunpack.c.l.b16 %v775_v56  ;;  %v777_v8 = vunpack.c.h.b16 %v775_v56  ;;  %v1880_v2 = vunpack.c.l.b16 %v1879_v55  ;;  %v1881_v33 = vunpack.c.h.b16 %v1879_v55  ;;  %v4650_v48 = vld.sshfl [vmem:[#allocation2 + $0x40] sm:$0x5 pattern:$0x75316420] }
 0x178   : > { %v1693_v36 = vunpack.c.l.b16 %v1692_v59  ;;  %v1694_v4 = vunpack.c.h.b16 %v1692_v59  ;;  %v1142_v13 = vpack.i.b16 %v1141_v1, %v1140_v63  ;;  %v4639_v16 = vrot.slane %v1062_v58, %v4491_v6  ;;  %v4653_v56 = vld.sshfl [vmem:[#allocation2 + $0x48] sm:$0x5 pattern:$0x75316420] }
 0x179   : > { %v778_v9 = vpack.i.b16 %v777_v8, %v776_v62  ;;  %v1882_v17 = vpack.i.b16 %v1881_v33, %v1880_v2  ;;  %v4642_v38 = vrot.slane %v939_v60, %v4491_v6  ;;  %v1094_v23 = vcombine.high %v1077_v18, %v4627_v49 }
 0x17a   : > { %v1695_v19 = vpack.i.b16 %v1694_v4, %v1693_v36  ;;  %v1143_v21 = vunpack.c.l.b16 %v1142_v13  ;;  %v1144_v24 = vunpack.c.h.b16 %v1142_v13  ;;  %v972_v28 = vunpack.c.l.b16 %v968_v14 }
 0x17b   : > { %2748 = vmatmul.mubr.bf16.gmra.mrb[12].mxu1 %v778_v9  ;;  %v973_v29 = vunpack.c.h.b16 %v968_v14  ;;  %2942 = vmatprep.mubr.bf16.mxu0 %v1882_v17  ;;  %v1092_v35 = vcombine.high %v1070_v61, %v4639_v16  ;;  %v970_v31 = vcombine.low %v4567_v40, %v4642_v38  ;;  %v1160_v42 = vunpack.c.l.b16 %v1094_v23  ;;  %v4139_v14 = vld [vmem:[#allocation4 + $0x148] sm:$0xff]  }
 0x17c   : > { %v1696_v32 = vunpack.c.l.b16 %v1695_v19  ;;  %v1697_v3 = vunpack.c.h.b16 %v1695_v19  ;;  %v1145_v10 = vpack.i.b16 %v1144_v24, %v1143_v21  ;;  %v1161_v44 = vunpack.c.h.b16 %v1094_v23 }
 0x17d   : > { %v974_v46 = vpack.i.b16 %v973_v29, %v972_v28  ;;  %v1150_v25 = vunpack.c.l.b16 %v1092_v35  ;;  %v1151_v45 = vunpack.c.h.b16 %v1092_v35  ;;  %v982_v47 = vunpack.c.l.b16 %v970_v31 }
 0x17e   : > { %v1698_v18 = vpack.i.b16 %v1697_v3, %v1696_v32  ;;  %v1146_v30 = vunpack.c.l.b16 %v1145_v10  ;;  %v1147_v39 = vunpack.c.h.b16 %v1145_v10  ;;  %v983_v52 = vunpack.c.h.b16 %v970_v31  ;;  %v3623_v32 = vld.sshfl [vmem:[#allocation2 + $0x28] sm:$0xfa pattern:$0x75316420] }
 0x17f   : > { %v975_v26 = vunpack.c.l.b16 %v974_v46  ;;  %v976_v50 = vunpack.c.h.b16 %v974_v46  ;;  %v1152_v51 = vpack.i.b16 %v1151_v45, %v1150_v25  ;;  %v1162_v53 = vpack.i.b16 %v1161_v44, %v1160_v42  ;;  %v4140_v46 = vld [vmem:[#allocation4 + $0x108] sm:$0xff]   ;;  %v4141_v25 = vld [vmem:[#allocation4 + $0x150] sm:$0xff]  }
 0x180   : > { %2943 = vmatmul.mubr.bf16.gmra.mrb[20].mxu0 %v1698_v18  ;;  %v969_v54 = vcombine.high %v4540_v41, %v960_v57  ;;  %v1148_v27 = vpack.i.b16 %v1147_v39, %v1146_v30  ;;  %v1123_v55 = vcombine.low %v3608_v37, %v4648_v7  ;;  %v1124_v59 = vcombine.low %v4650_v48, %v4653_v56  ;;  %v4138_v57 = vld [vmem:[#allocation4 + $0x100] sm:$0xff]  }
 0x181   : > { %v977_v58 = vpack.i.b16 %v976_v50, %v975_v26  ;;  %3168 = vmatprep.mubr.bf16.mxu0 %v4296_v22  ;;  %v1153_v61 = vunpack.c.l.b16 %v1152_v51  ;;  %v1154_v60 = vunpack.c.h.b16 %v1152_v51  ;;  %v984_v62 = vpack.i.b16 %v983_v52, %v982_v47  ;;  %v4666_v37 = vld.sshfl [vmem:[#allocation2 + $0x20] sm:$0xfa pattern:$0x75316420] }
 0x182   : > { %v1163_v8 = vunpack.c.l.b16 %v1162_v53  ;;  %2788 = vmatprep.mubr.bf16.mxu1 %v1148_v27  ;;  %v1164_v2 = vunpack.c.h.b16 %v1162_v53  ;;  %v992_v41 = vunpack.c.l.b16 %v969_v54  ;;  %v993_v9 = vunpack.c.h.b16 %v969_v54  ;;  %v4142_v54 = vld [vmem:[#allocation4 + $0x110] sm:$0xff]  }
 0x183   : > { %v978_v63 = vunpack.c.l.b16 %v977_v58  ;;  %v979_v1 = vunpack.c.h.b16 %v977_v58  ;;  %v1155_v33 = vpack.i.b16 %v1154_v60, %v1153_v61  ;;  %v985_v36 = vunpack.c.l.b16 %v984_v62  ;;  %v4143_v60 = vld [vmem:[#allocation4 + $0x158] sm:$0xff]  }
 0x184   : > { %v986_v4 = vunpack.c.h.b16 %v984_v62  ;;  %v1165_v17 = vpack.i.b16 %v1164_v2, %v1163_v8  ;;  %v1131_v19 = vrot.slane %v1123_v55, %v4491_v6  ;;  %v4661_v23 = vrot.slane %v1124_v59, %v4491_v6 }
 0x185   : > { %v980_v13 = vpack.i.b16 %v979_v1, %v978_v63  ;;  %v1156_v21 = vunpack.c.l.b16 %v1155_v33  ;;  %v1157_v24 = vunpack.c.h.b16 %v1155_v33  ;;  %v994_v29 = vpack.i.b16 %v993_v9, %v992_v41 }
 0x186   : > { %v987_v28 = vpack.i.b16 %v986_v4, %v985_v36  ;;  %v1166_v3 = vunpack.c.l.b16 %v1165_v17  ;;  %v1139_v35 = vcombine.low %v1131_v19, %v4661_v23  ;;  %v971_v31 = vcombine.high %v4567_v40, %v4642_v38 }
 0x187   : > { %2789 = vmatmul.mubr.bf16.vlgmr.msra.gmra.mrb[16].mxu1 %v980_v13  ;;  %v1158_v10 = vpack.i.b16 %v1157_v24, %v1156_v21  ;;  %v1167_v44 = vunpack.c.h.b16 %v1165_v17  ;;  %v995_v18 = vunpack.c.l.b16 %v994_v29  ;;  %v996_v47 = vunpack.c.h.b16 %v994_v29  ;;  %v4144_v13 = vld [vmem:[#allocation4 + $0x118] sm:$0xff]   ;;  %v4145_v21 = vld [vmem:[#allocation4 + $0x160] sm:$0xff]  }
 0x188   : > { %3865 = vmatpush3.bf16.msra.mxu1 %v4138_v57  ;;  %v988_v42 = vunpack.c.l.b16 %v987_v28  ;;  %v989_v45 = vunpack.c.h.b16 %v987_v28  ;;  %v1170_v30 = vunpack.c.l.b16 %v1139_v35  ;;  %v1171_v39 = vunpack.c.h.b16 %v1139_v35 }
 0x189   : > { %3866 = vmatprep.subr.bf16.mxu1 %v4139_v14  ;;  %2796 = vmatprep.mubr.bf16.mxu1 %v1158_v10  ;;  %v1002_v26 = vunpack.c.l.b16 %v971_v31  ;;  %v1003_v50 = vunpack.c.h.b16 %v971_v31  ;;  %v1399_v51 = vcombine.high %v4666_v37, %v3623_v32  ;;  %v997_v40 = vpack.i.b16 %v996_v47, %v995_v18  ;;  %v3627_v18 = vld.sshfl [vmem:[#allocation2 + $0x58] sm:$0x5 pattern:$0x75316420] }
 0x18a   : > { %v1172_v38 = vpack.i.b16 %v1171_v39, %v1170_v30  ;;  %v1229_v52 = vcombine.high %v4606_v0, %v4619_v20  ;;  %v1231_v53 = vcombine.high %v4614_v43, %v4666_v37  ;;  %v1168_v27 = vpack.i.b16 %v1167_v44, %v1166_v3  ;;  %v4684_v39 = vld.sshfl [vmem:[#allocation2 + $0x50] sm:$0x5 pattern:$0x75316420] }
 0x18b   : > { %v1004_v58 = vpack.i.b16 %v1003_v50, %v1002_v26  ;;  %v1427_v55 = vrot.slane %v1399_v51, %v4491_v6  ;;  %v1398_v59 = vcombine.low %v4666_v37, %v3623_v32  ;;  %v990_v61 = vpack.i.b16 %v989_v45, %v988_v42 }
 0x18c   : > { %3867 = vmatpush3.bf16.msra.mxu1 %v4140_v46  ;;  %v998_v62 = vunpack.c.l.b16 %v997_v40  ;;  %v1173_v8 = vunpack.c.l.b16 %v1172_v38  ;;  %v1174_v63 = vunpack.c.h.b16 %v1172_v38  ;;  %v999_v1 = vunpack.c.h.b16 %v997_v40 }
 0x18d   : > { %3868 = vmatprep.subr.bf16.mxu1 %v4141_v25  ;;  %v1005_v2 = vunpack.c.l.b16 %v1004_v58  ;;  %v1006_v41 = vunpack.c.h.b16 %v1004_v58  ;;  %v1429_v57 = vcombine.low %v4627_v49, %v1427_v55  ;;  %v1245_v36 = vrot.slane %v1229_v52, %v4491_v6  ;;  %v4146_v25 = vld [vmem:[#allocation4 + $0x120] sm:$0xff]   ;;  %v4148_v58 = vld [vmem:[#allocation4 + $0x128] sm:$0xff]  }
 0x18e   : > { %v1175_v33 = vpack.i.b16 %v1174_v63, %v1173_v8  ;;  %v1259_v4 = vrot.slane %v1231_v53, %v4491_v6  ;;  %v1420_v9 = vrot.slane %v1398_v59, %v4491_v6  ;;  %v1228_v29 = vcombine.low %v4606_v0, %v4619_v20  ;;  %v4147_v0 = vld [vmem:[#allocation4 + $0x168] sm:$0xff]   ;;  %v4149_v8 = vld [vmem:[#allocation4 + $0x170] sm:$0xff]  }
 0x18f   : > { %2797 = vmatmul.mubr.bf16.gmra.mrb[20].mxu1 %v990_v61  ;;  %v1007_v14 = vpack.i.b16 %v1006_v41, %v1005_v2  ;;  %v1476_v17 = vunpack.c.l.b16 %v1429_v57  ;;  %v1477_v19 = vunpack.c.h.b16 %v1429_v57  ;;  %v1230_v32 = vcombine.low %v4614_v43, %v4666_v37 }
 0x190   : > { %3869 = vmatpush3.bf16.msra.mxu1 %v4142_v54  ;;  %2804 = vmatprep.mubr.bf16.mxu1 %v1168_v27  ;;  %v1261_v24 = vcombine.low %v1245_v36, %v1259_v4  ;;  %v1428_v28 = vcombine.high %v4639_v16, %v1420_v9  ;;  %v1176_v3 = vunpack.c.l.b16 %v1175_v33  ;;  %v1177_v35 = vunpack.c.h.b16 %v1175_v33  ;;  %v4150_v33 = vld [vmem:[#allocation4 + $0x130] sm:$0xff]  }
 0x191   : > { %3870 = vmatprep.subr.bf16.mxu1 %v4143_v60  ;;  %v1478_v31 = vpack.i.b16 %v1477_v19, %v1476_v17  ;;  %v1000_v10 = vpack.i.b16 %v999_v1, %v998_v62  ;;  %v1008_v45 = vunpack.c.l.b16 %v1007_v14  ;;  %v1238_v43 = vrot.slane %v1228_v29, %v4491_v6 }
 0x192   : > { %v1308_v46 = vunpack.c.l.b16 %v1261_v24  ;;  %v1309_v42 = vunpack.c.h.b16 %v1261_v24  ;;  %v1486_v44 = vunpack.c.l.b16 %v1428_v28  ;;  %v1487_v16 = vunpack.c.h.b16 %v1428_v28 }
 0x193   : > { %v1479_v47 = vunpack.c.l.b16 %v1478_v31  ;;  %v1480_v30 = vunpack.c.h.b16 %v1478_v31  ;;  %v1252_v37 = vrot.slane %v1230_v32, %v4491_v6  ;;  %v1430_v26 = vcombine.high %v4627_v49, %v1427_v55 }
 0x194   : > { %3871 = vmatpush3.bf16.msra.mxu1 %v4144_v13  ;;  %v1310_v20 = vpack.i.b16 %v1309_v42, %v1308_v46  ;;  %v1178_v50 = vpack.i.b16 %v1177_v35, %v1176_v3  ;;  %v1009_v51 = vunpack.c.h.b16 %v1007_v14  ;;  %v1488_v38 = vpack.i.b16 %v1487_v16, %v1486_v44  ;;  %v3645_v35 = vld.sshfl [vmem:[#allocation2 + $0x18] sm:$0xaa pattern:$0x75316420] }
 0x195   : > { %3872 = vmatprep.subr.bf16.mxu1 %v4145_v21  ;;  %v1481_v40 = vpack.i.b16 %v1480_v30, %v1479_v47  ;;  %v1260_v54 = vcombine.high %v1238_v43, %v1252_v37  ;;  %v1460_v27 = vcombine.low %v4684_v39, %v3627_v18  ;;  %v1496_v62 = vunpack.c.l.b16 %v1430_v26  ;;  %v4151_v21 = vld [vmem:[#allocation4 + $0x178] sm:$0xff]   ;;  %v3647_v46 = vld.sshfl [vmem:[#allocation2 + $0x28] sm:$0xaa pattern:$0x75316420] }
 0x196   : > { %v1311_v52 = vunpack.c.l.b16 %v1310_v20  ;;  %v1312_v53 = vunpack.c.h.b16 %v1310_v20  ;;  %v1489_v61 = vunpack.c.l.b16 %v1488_v38  ;;  %v1490_v60 = vunpack.c.h.b16 %v1488_v38  ;;  %v4152_v42 = vld [vmem:[#allocation4 + $0x138] sm:$0xff]  }
 0x197   : > { %2805 = vmatmul.mubr.bf16.gmra.mrb[24].mxu1 %v1000_v10  ;;  %v1482_v59 = vunpack.c.l.b16 %v1481_v40  ;;  %v1483_v49 = vunpack.c.h.b16 %v1481_v40  ;;  %v1318_v55 = vunpack.c.l.b16 %v1260_v54  ;;  %v1319_v63 = vunpack.c.h.b16 %v1260_v54  ;;  %v4697_v43 = vld.sshfl [vmem:[#allocation2 + $0x58] sm:$0x55 pattern:$0x75316420]  ;;  %v4154_v54 = vld [vmem:[#allocation4 + $0x208] sm:$0xff]  }
 0x198   : > { %3873 = vmatpush3.bf16.msra.mxu1 %v4146_v25  ;;  %2812 = vmatprep.mubr.bf16.mxu1 %v1178_v50  ;;  %v1497_v1 = vunpack.c.h.b16 %v1430_v26  ;;  %v1313_v2 = vpack.i.b16 %v1312_v53, %v1311_v52  ;;  %v1262_v41 = vcombine.high %v1245_v36, %v1259_v4  ;;  %v1491_v9 = vpack.i.b16 %v1490_v60, %v1489_v61  ;;  %v3644_v25 = vld.sshfl [vmem:[#allocation2 + $0x10] sm:$0xaa pattern:$0x75316420] }
 0x199   : > { %3874 = vmatprep.subr.bf16.mxu1 %v4147_v0  ;;  %v1320_v57 = vpack.i.b16 %v1319_v63, %v1318_v55  ;;  %v1474_v14 = vrot.slane %v1460_v27, %v4491_v6  ;;  %v1010_v17 = vpack.i.b16 %v1009_v51, %v1008_v45  ;;  %v1484_v19 = vpack.i.b16 %v1483_v49, %v1482_v59  ;;  %v4153_v45 = vld [vmem:[#allocation4 + $0x200] sm:$0xff]   ;;  %v3650_v52 = vld.sshfl [vmem:[#allocation2 + $0x50] sm:$0x55 pattern:$0x75316420] }
 0x19a   : > { %v1498_v13 = vpack.i.b16 %v1497_v1, %v1496_v62  ;;  %v1291_v24 = vcombine.low %v4648_v7, %v4650_v48  ;;  %v1314_v28 = vunpack.c.l.b16 %v1313_v2  ;;  %v1315_v29 = vunpack.c.h.b16 %v1313_v2  ;;  %v3646_v0 = vld.sshfl [vmem:[#allocation2 + $0x20] sm:$0xaa pattern:$0x75316420] }
 0x19b   : > { %v1328_v32 = vunpack.c.l.b16 %v1262_v41  ;;  %v1329_v3 = vunpack.c.h.b16 %v1262_v41  ;;  %v1321_v36 = vunpack.c.l.b16 %v1320_v57  ;;  %v1322_v4 = vunpack.c.h.b16 %v1320_v57  ;;  %v4700_v26 = vld.sshfl [vmem:[#allocation2 + $0x40] sm:$0x55 pattern:$0x75316420] }
 0x19c   : > { %3875 = vmatpush3.bf16.msra.mxu1 %v4148_v58  ;;  %v1475_v31 = vcombine.low %v4661_v23, %v1474_v14  ;;  %v1292_v10 = vcombine.low %v4653_v56, %v4684_v39  ;;  %v1492_v44 = vunpack.c.l.b16 %v1491_v9  ;;  %v1493_v18 = vunpack.c.h.b16 %v1491_v9  ;;  %v3649_v61 = vld.sshfl [vmem:[#allocation2 + $0x48] sm:$0x55 pattern:$0x75316420] }
 0x19d   : > { %3876 = vmatprep.subr.bf16.mxu1 %v4149_v8  ;;  %v1499_v7 = vunpack.c.l.b16 %v1498_v13  ;;  %v1500_v48 = vunpack.c.h.b16 %v1498_v13  ;;  %v1299_v16 = vrot.slane %v1291_v24, %v4491_v6  ;;  %v1932_v23 = vcombine.low %v3644_v25, %v3645_v35  ;;  %v4155_v13 = vld [vmem:[#allocation4 + $0x210] sm:$0xff]  }
 0x19e   : > { %v1506_v47 = vunpack.c.l.b16 %v1475_v31  ;;  %v1507_v30 = vunpack.c.h.b16 %v1475_v31  ;;  %v1330_v20 = vpack.i.b16 %v1329_v3, %v1328_v32  ;;  %v1323_v56 = vpack.i.b16 %v1322_v4, %v1321_v36  ;;  %v4156_v31 = vld [vmem:[#allocation4 + $0x218] sm:$0xff]  }
 0x19f   : > { %2813 = vmatmul.mubr.bf16.gmra.mrb[28].mxu1 %v1010_v17  ;;  %v1306_v37 = vrot.slane %v1292_v10, %v4491_v6  ;;  %v1316_v50 = vpack.i.b16 %v1315_v29, %v1314_v28  ;;  %v1933_v51 = vcombine.high %v3644_v25, %v3645_v35  ;;  %v1934_v40 = vcombine.low %v3646_v0, %v3647_v46 }
 0x1a0   : > { %3877 = vmatpush3.bf16.msra.mxu1 %v4150_v33  ;;  %2853 = vmatprep.mubr.bf16.mxu1 %v1484_v19  ;;  %v1508_v39 = vpack.i.b16 %v1507_v30, %v1506_v47  ;;  %v1935_v38 = vcombine.high %v3646_v0, %v3647_v46  ;;  %v1494_v53 = vpack.i.b16 %v1493_v18, %v1492_v44  ;;  %v1331_v60 = vunpack.c.l.b16 %v1330_v20  ;;  %v4157_v0 = vld [vmem:[#allocation4 + $0x220] sm:$0xff]  }
 0x1a1   : > { %3878 = vmatprep.subr.bf16.mxu1 %v4151_v21  ;;  %v1501_v27 = vpack.i.b16 %v1500_v48, %v1499_v7  ;;  %v1307_v58 = vcombine.low %v1299_v16, %v1306_v37  ;;  %v1942_v59 = vrot.slane %v1932_v23, %v4491_v6  ;;  %v1332_v62 = vunpack.c.h.b16 %v1330_v20 }
 0x1a2   : > { %v1956_v8 = vrot.slane %v1934_v40, %v4491_v6  ;;  %v1994_v49 = vcombine.low %v4700_v26, %v3649_v61  ;;  %v1324_v55 = vunpack.c.l.b16 %v1323_v56  ;;  %v1325_v63 = vunpack.c.h.b16 %v1323_v56 }
 0x1a3   : > { %v1509_v1 = vunpack.c.l.b16 %v1508_v39  ;;  %v1996_v2 = vcombine.low %v3650_v52, %v4697_v43  ;;  %v1510_v41 = vunpack.c.h.b16 %v1508_v39  ;;  %v1949_v57 = vrot.slane %v1933_v51, %v4491_v6 }
 0x1a4   : > { %3879 = vmatpush3.bf16.msra.mxu1 %v4152_v42  ;;  %v1963_v33 = vrot.slane %v1935_v38, %v4491_v6  ;;  %v1964_v9 = vcombine.high %v1942_v59, %v1956_v8  ;;  %v1502_v14 = vunpack.c.l.b16 %v1501_v27  ;;  %v1503_v17 = vunpack.c.h.b16 %v1501_v27  ;;  %v4158_v38 = vld [vmem:[#allocation4 + $0x228] sm:$0xff]  }
 0x1a5   : > { %3972 = vmatprep.subr.bf16.mxu1 %v4153_v45  ;;  %v1338_v19 = vunpack.c.l.b16 %v1307_v58  ;;  %v1339_v21 = vunpack.c.h.b16 %v1307_v58  ;;  %v2004_v29 = vrot.slane %v1994_v49, %v4491_v6  ;;  %v2018_v32 = vrot.slane %v1996_v2, %v4491_v6 }
 0x1a6   : > { %v2028_v24 = vunpack.c.l.b16 %v1964_v9  ;;  %v2029_v28 = vunpack.c.h.b16 %v1964_v9  ;;  %v1333_v3 = vpack.i.b16 %v1332_v62, %v1331_v60  ;;  %v1511_v35 = vpack.i.b16 %v1510_v41, %v1509_v1 }
 0x1a7   : > { %2854 = vmatmul.mubr.bf16.vlgmr.msra.gmra.mrb[32].mxu1 %v1316_v50  ;;  %v1965_v36 = vcombine.high %v1949_v57, %v1963_v33  ;;  %v1326_v4 = vpack.i.b16 %v1325_v63, %v1324_v55  ;;  %v1340_v10 = vpack.i.b16 %v1339_v21, %v1338_v19  ;;  %v1995_v46 = vcombine.high %v4700_v26, %v3649_v61  ;;  %v4160_v57 = vld [vmem:[#allocation4 + $0x238] sm:$0xff]  }
 0x1a8   : > { %3973 = vmatpush3.bf16.msra.mxu1 %v4153_v45  ;;  %2861 = vmatprep.mubr.bf16.mxu1 %v1494_v53  ;;  %v1997_v42 = vcombine.high %v3650_v52, %v4697_v43  ;;  %v1504_v44 = vpack.i.b16 %v1503_v17, %v1502_v14  ;;  %v2030_v18 = vpack.i.b16 %v2029_v28, %v2028_v24  ;;  %v1334_v48 = vunpack.c.l.b16 %v1333_v3 }
 0x1a9   : > { %3974 = vmatprep.subr.bf16.mxu1 %v4154_v54  ;;  %v2026_v7 = vcombine.low %v2004_v29, %v2018_v32  ;;  %v1335_v25 = vunpack.c.h.b16 %v1333_v3  ;;  %v1512_v45 = vunpack.c.l.b16 %v1511_v35  ;;  %v1513_v47 = vunpack.c.h.b16 %v1511_v35 }
 0x1aa   : > { %v2038_v30 = vunpack.c.l.b16 %v1965_v36  ;;  %v2039_v16 = vunpack.c.h.b16 %v1965_v36  ;;  %v1341_v23 = vunpack.c.l.b16 %v1340_v10  ;;  %v1342_v20 = vunpack.c.h.b16 %v1340_v10  ;;  %v4161_v10 = vld [vmem:[%s4946_s5] ss:$8 sps:$4 sm:$0xff]  }
 0x1ab   : > { %v2011_v56 = vrot.slane %v1995_v46, %v4491_v6  ;;  %v2025_v43 = vrot.slane %v1997_v42, %v4491_v6  ;;  %v2031_v39 = vunpack.c.l.b16 %v2030_v18  ;;  %v2032_v37 = vunpack.c.h.b16 %v2030_v18  ;;  %v4159_v6 = vld [vmem:[#allocation4 + $0x230] sm:$0xff]   ;;  %v4163_v46 = vld [vmem:[%s4946_s5 + $0x4] ss:$8 sps:$4 sm:$0xff]   ;;  %v4167_v18 = vld [vmem:[%s4946_s5 + $0x20] ss:$8 sps:$4 sm:$0xff]  }
 0x1ac   : > { %3975 = vmatpush3.bf16.msra.mxu1 %v4154_v54  ;;  %v2048_v26 = vunpack.c.l.b16 %v2026_v7  ;;  %v2049_v50 = vunpack.c.h.b16 %v2026_v7  ;;  %v2040_v51 = vpack.i.b16 %v2039_v16, %v2038_v30  ;;  %v1336_v40 = vpack.i.b16 %v1335_v25, %v1334_v48  ;;  %3136 = vmatprep.subr.bf16.mxu0 %v4163_v46  ;;  %v4166_v42 = vld [vmem:[%s4946_s5 + $0x14] ss:$8 sps:$4 sm:$0xff]   ;;  %v4169_v7 = vld [vmem:[%s4946_s5 + $0x24] ss:$8 sps:$4 sm:$0xff]   ;;  %v4170_v25 = vld [vmem:[%s4946_s5 + $0x30] ss:$8 sps:$4 sm:$0xff]  }
 0x1ad   : > { %3976 = vmatprep.subr.bf16.mxu1 %v4155_v13  ;;  %v1343_v52 = vpack.i.b16 %v1342_v20, %v1341_v23  ;;  %v2027_v53 = vcombine.low %v2011_v56, %v2025_v43  ;;  %v1514_v54 = vpack.i.b16 %v1513_v47, %v1512_v45  ;;  %v2033_v27 = vpack.i.b16 %v2032_v37, %v2031_v39  ;;  %v4172_v48 = vld [vmem:[%s4946_s5 + $0x34] ss:$8 sps:$4 sm:$0xff]   ;;  %v4173_v45 = vld [vmem:[%s4946_s5 + $0x40] ss:$8 sps:$4 sm:$0xff]   ;;  %v4175_v47 = vld [vmem:[%s4946_s5 + $0x44] ss:$8 sps:$4 sm:$0xff]  }
 0x1ae   : > { %v2050_v58 = vpack.i.b16 %v2049_v50, %v2048_v26  ;;  %v2041_v59 = vunpack.c.l.b16 %v2040_v51  ;;  %v2042_v61 = vunpack.c.h.b16 %v2040_v51  ;;  %3137 = vmatpush1.bf16.msra.mxu0 %v4161_v10  ;;  %v4178_v30 = vld [vmem:[%s4946_s5 + $0x54] ss:$8 sps:$4 sm:$0xff]   ;;  %v4176_v16 = vld [vmem:[%s4946_s5 + $0x50] ss:$8 sps:$4 sm:$0xff]   ;;  %v4181_v23 = vld [vmem:[%s4946_s5 + $0x64] ss:$8 sps:$4 sm:$0xff]  }
 0x1af   : > { %2862 = vmatmul.mubr.bf16.gmra.mrb[36].mxu1 %v1326_v4  ;;  %v1344_v60 = vunpack.c.l.b16 %v1343_v52  ;;  %v1345_v62 = vunpack.c.h.b16 %v1343_v52  ;;  %v2058_v8 = vunpack.c.l.b16 %v2027_v53  ;;  %v2059_v49 = vunpack.c.h.b16 %v2027_v53  ;;  %3138 = vmatprep.subr.bf16.mxu0 %v4166_v42  ;;  %v4182_v20 = vld [vmem:[%s4946_s5 + $0x70] ss:$8 sps:$4 sm:$0xff]   ;;  %v4184_v56 = vld [vmem:[%s4946_s5 + $0x74] ss:$8 sps:$4 sm:$0xff]   ;;  %v4187_v43 = vld [vmem:[%s4948_s7 + $0x4] ss:$8 sps:$4 sm:$0xff]  }
 0x1b0   : > { %3977 = vmatpush3.bf16.msra.mxu1 %v4155_v13  ;;  %2869 = vmatprep.mubr.bf16.mxu1 %v1504_v44  ;;  %v2034_v55 = vunpack.c.l.b16 %v2033_v27  ;;  %v2035_v63 = vunpack.c.h.b16 %v2033_v27  ;;  %v2051_v1 = vunpack.c.l.b16 %v2050_v58  ;;  %v2052_v2 = vunpack.c.h.b16 %v2050_v58  ;;  %v4164_v44 = vld [vmem:[%s4946_s5 + $0x10] ss:$8 sps:$4 sm:$0xff]  }
 0x1b1   : > { %3978 = vmatprep.subr.bf16.mxu1 %v4156_v31  ;;  %v1346_v41 = vpack.i.b16 %v1345_v62, %v1344_v60  ;;  %v2043_v33 = vpack.i.b16 %v2042_v61, %v2041_v59  ;;  %v2060_v9 = vpack.i.b16 %v2059_v49, %v2058_v8 }
 0x1b2   : > { %v2036_v13 = vpack.i.b16 %v2035_v63, %v2034_v55  ;;  %v2053_v14 = vpack.i.b16 %v2052_v2, %v2051_v1  ;;  %3139 = vmatpush1.bf16.msra.mxu0 %v4164_v44 }
 0x1b3   : > { %v2044_v17 = vunpack.c.l.b16 %v2043_v33  ;;  %v2045_v19 = vunpack.c.h.b16 %v2043_v33  ;;  %v2061_v21 = vunpack.c.l.b16 %v2060_v9  ;;  %v2062_v24 = vunpack.c.h.b16 %v2060_v9  ;;  %3140 = vmatprep.subr.bf16.mxu0 %v4169_v7 }
 0x1b4   : > { %3979 = vmatpush3.bf16.msra.mxu1 %v4156_v31  ;;  %v2054_v28 = vunpack.c.l.b16 %v2053_v14  ;;  %v2055_v29 = vunpack.c.h.b16 %v2053_v14 }
 0x1b5   : > { %3980 = vmatprep.subr.bf16.mxu1 %v4157_v0  ;;  %v2046_v32 = vpack.i.b16 %v2045_v19, %v2044_v17  ;;  %v2063_v3 = vpack.i.b16 %v2062_v24, %v2061_v21 }
 0x1b6   : > { %v2056_v35 = vpack.i.b16 %v2055_v29, %v2054_v28  ;;  %3141 = vmatpush1.bf16.msra.mxu0 %v4167_v18 }
 0x1b7   : > { %2870 = vmatmul.mubr.bf16.gmra.mrb[40].mxu1 %v1336_v40  ;;  %v2064_v36 = vunpack.c.l.b16 %v2063_v3  ;;  %v2065_v4 = vunpack.c.h.b16 %v2063_v3  ;;  %3142 = vmatprep.subr.bf16.mxu0 %v4172_v48 }
 0x1b8   : > { %3981 = vmatpush3.bf16.msra.mxu1 %v4157_v0  ;;  %2877 = vmatprep.mubr.bf16.mxu1 %v1514_v54  ;;  %v4179_v0 = vld [vmem:[%s4946_s5 + $0x60] ss:$8 sps:$4 sm:$0xff]  }
 0x1b9   : > { %3982 = vmatprep.subr.bf16.mxu1 %v4158_v38  ;;  %v2066_v31 = vpack.i.b16 %v2065_v4, %v2064_v36 }
 0x1ba   : > { %3143 = vmatpush1.bf16.msra.mxu0 %v4170_v25  ;;  %v3652_v25 = vld [vmem:[%s4945_s4] ss:$0 sm:$0xff] }
 0x1bb   : > { %3144 = vmatprep.subr.bf16.mxu0 %v4175_v47 }
 0x1bc   : > { %3983 = vmatpush3.bf16.msra.mxu1 %v4158_v38 }
 0x1bd   : > { %3984 = vmatprep.subr.bf16.mxu1 %v4159_v6 }
 0x1be   : > { %3145 = vmatpush1.bf16.msra.mxu0 %v4173_v45 }
 0x1bf   : > { %2878 = vmatmul.mubr.bf16.gmra.mrb[44].mxu1 %v1346_v41  ;;  %3146 = vmatprep.subr.bf16.mxu0 %v4178_v30 }
 0x1c0   : > { %3985 = vmatpush3.bf16.msra.mxu1 %v4159_v6  ;;  %3988 = vmatprep.mubr.bf16.mxu1 %v2036_v13 }
 0x1c1   : > { %3986 = vmatprep.subr.bf16.mxu1 %v4160_v57 }
 0x1c2   : > { %3147 = vmatpush1.bf16.msra.mxu0 %v4176_v16 }
 0x1c3   : > { %3148 = vmatprep.subr.bf16.mxu0 %v4181_v23 }
 0x1c4   : > { %3987 = vmatpush3.bf16.msra.mxu1 %v4160_v57 }
 0x1c6   : > { %3149 = vmatpush1.bf16.msra.mxu0 %v4179_v0 }
 0x1c7   : > { %3989 = vmatmul.mubr.bf16.vlgmr.msra.gmra.mrb[48].mxu1 %v2046_v32  ;;  %3150 = vmatprep.subr.bf16.mxu0 %v4184_v56 }
 0x1c8   : > { %3992 = vmatprep.mubr.bf16.mxu1 %v2056_v35 }
 0x1ca   : > { %3151 = vmatpush1.bf16.msra.mxu0 %v4182_v20 }
 0x1cb   : > { %3257 = vmatprep.subr.bf16.mxu0 %v4187_v43 }
 0x1cf   : > { %3993 = vmatmul.mubr.bf16.gmra.mrb[52].mxu1 %v2066_v31 }
 0x22c   : > { %v3800_v39 = vpop.f32.mrb[0].mxu1 }
 0x22d   : > { %v3801_v37 = vpop.f32.mrb[1].mxu1 }
 0x22e   : > { %v3802_v26 = vadd.f32 %v3801_v37, %v3800_v39  ;;  %v3803_v50 = vpop.f32.mrb[2].mxu1  ;;  %v3920_v51 = vpop.f32.mrb[8].mxu0 }
 0x22f   : > { %v3804_v40 = vpop.f32.mrb[3].mxu1  ;;  %v3921_v38 = vpop.f32.mrb[9].mxu0 }
 0x230   : > { %v3805_v52 = vadd.f32 %v3804_v40, %v3803_v50  ;;  %v4765_v53 = vadd.f32 %v3921_v38, %v3920_v51  ;;  %v3923_v54 = vpop.f32.mrb[10].mxu0  ;;  %v2726_v30 = vadd.f32 %v3802_v26, %v3652_v25 }
 0x231   : > { %v3924_v27 = vpop.f32.mrb[11].mxu0 }
 0x232   : > { %v4767_v58 = vadd.f32 %v3924_v27, %v3923_v54  ;;  %v2729_v20 = vadd.f32 %v3805_v52, %v3652_v25 }
 0x236   : > { %v3806_v59 = vpop.f32.mrb[4].mxu1 }
 0x237   : > { %v3807_v61 = vpop.f32.mrb[5].mxu1 }
 0x238   : > { %v3808_v6 = vadd.f32 %v3807_v61, %v3806_v59  ;;  %v3809_v60 = vpop.f32.mrb[6].mxu1 }
 0x239   : > { %v3810_v62 = vpop.f32.mrb[7].mxu1 }
 0x23a   : > { %v3811_v8 = vadd.f32 %v3810_v62, %v3809_v60  ;;  %v2734_v51 = vadd.f32 %v3808_v6, %v3652_v25 }
 0x23c   : > { %v2737_v27 = vadd.f32 %v3811_v8, %v3652_v25 }
 0x23d   : > { %v3926_v49 = vpop.f32.mrb[12].mxu0 }
 0x23e   : > { %v3927_v55 = vpop.f32.mrb[13].mxu0 }
 0x23f   : > { %v4769_v63 = vadd.f32 %v3927_v55, %v3926_v49  ;;  %v3929_v1 = vpop.f32.mrb[14].mxu0 }
 0x240   : > { %v3930_v2 = vpop.f32.mrb[15].mxu0  ;;  %v3812_v57 = vpop.f32.mrb[8].mxu1 }
 0x241   : > { %v4771_v41 = vadd.f32 %v3930_v2, %v3929_v1  ;;  %v3813_v33 = vpop.f32.mrb[9].mxu1 }
 0x242   : > { %v3814_v9 = vadd.f32 %v3813_v33, %v3812_v57  ;;  %v3815_v13 = vpop.f32.mrb[10].mxu1 }
 0x243   : > { %v3816_v14 = vpop.f32.mrb[11].mxu1 }
 0x244   : > { %v3817_v17 = vadd.f32 %v3816_v14, %v3815_v13  ;;  %v2742_v26 = vadd.f32 %v3814_v9, %v3652_v25 }
 0x246   : > { %v3932_v19 = vpop.f32.mrb[16].mxu0  ;;  %v2745_v52 = vadd.f32 %v3817_v17, %v3652_v25 }
 0x247   : > { %v3933_v21 = vpop.f32.mrb[17].mxu0 }
 0x248   : > { %v4773_v24 = vadd.f32 %v3933_v21, %v3932_v19  ;;  %v3935_v28 = vpop.f32.mrb[18].mxu0 }
 0x249   : > { %v3936_v29 = vpop.f32.mrb[19].mxu0 }
 0x24a   : > { %v4775_v32 = vadd.f32 %v3936_v29, %v3935_v28 }
 0x24e   : > { %v3818_v3 = vpop.f32.mrb[12].mxu1 }
 0x24f   : > { %v3819_v35 = vpop.f32.mrb[13].mxu1 }
 0x250   : > { %v3820_v36 = vadd.f32 %v3819_v35, %v3818_v3  ;;  %v3821_v4 = vpop.f32.mrb[14].mxu1 }
 0x251   : > { %v3822_v31 = vpop.f32.mrb[15].mxu1 }
 0x252   : > { %v3823_v10 = vadd.f32 %v3822_v31, %v3821_v4  ;;  %v2750_v6 = vadd.f32 %v3820_v36, %v3652_v25 }
 0x253   : > { %v3938_v46 = vpop.f32.mrb[20].mxu0 }
 0x254   : > { %v3939_v42 = vpop.f32.mrb[21].mxu0  ;;  %v2753_v8 = vadd.f32 %v3823_v10, %v3652_v25 }
 0x255   : > { %v4777_v44 = vadd.f32 %v3939_v42, %v3938_v46  ;;  %v3941_v18 = vpop.f32.mrb[22].mxu0 }
 0x256   : > { %v3942_v7 = vpop.f32.mrb[23].mxu0 }
 0x257   : > { %v4779_v48 = vadd.f32 %v3942_v7, %v3941_v18 }
 0x25a   : > { %v3840_v45 = vpop.f32.mrb[16].mxu1 }
 0x25b   : > { %v3841_v47 = vpop.f32.mrb[17].mxu1 }
 0x25c   : > { %v3842_v16 = vadd.f32 %v3841_v47, %v3840_v45  ;;  %v3843_v0 = vpop.f32.mrb[18].mxu1 }
 0x25d   : > { %v3844_v23 = vpop.f32.mrb[19].mxu1 }
 0x25e   : > { %v2791_v56 = vadd.f32 %v3842_v16, %v2726_v30  ;;  %v3845_v43 = vadd.f32 %v3844_v23, %v3843_v0 }
 0x260   : > { %v2794_v39 = vadd.f32 %v3845_v43, %v2729_v20 }
 0x262   : > { %v3846_v37 = vpop.f32.mrb[20].mxu1 }
 0x263   : > { %v3847_v50 = vpop.f32.mrb[21].mxu1 }
 0x264   : > { %v3848_v40 = vadd.f32 %v3847_v50, %v3846_v37  ;;  %v3849_v38 = vpop.f32.mrb[22].mxu1 }
 0x265   : > { %v3850_v54 = vpop.f32.mrb[23].mxu1 }
 0x266   : > { %v2799_v59 = vadd.f32 %v3848_v40, %v2734_v51  ;;  %v3851_v61 = vadd.f32 %v3850_v54, %v3849_v38 }
 0x268   : > { %v2802_v60 = vadd.f32 %v3851_v61, %v2737_v27 }
 0x26a   : > { %v3852_v62 = vpop.f32.mrb[24].mxu1 }
 0x26b   : > { %v3853_v49 = vpop.f32.mrb[25].mxu1 }
 0x26c   : > { %v3854_v55 = vadd.f32 %v3853_v49, %v3852_v62  ;;  %v3855_v1 = vpop.f32.mrb[26].mxu1 }
 0x26d   : > { %v3856_v2 = vpop.f32.mrb[27].mxu1 }
 0x26e   : > { %v2807_v57 = vadd.f32 %v3854_v55, %v2742_v26  ;;  %v3857_v33 = vadd.f32 %v3856_v2, %v3855_v1 }
 0x270   : > { %v2810_v13 = vadd.f32 %v3857_v33, %v2745_v52 }
 0x272   : > { %v3858_v14 = vpop.f32.mrb[28].mxu1 }
 0x273   : > { %v3859_v19 = vpop.f32.mrb[29].mxu1 }
 0x274   : > { %v3860_v21 = vadd.f32 %v3859_v19, %v3858_v14  ;;  %v3861_v28 = vpop.f32.mrb[30].mxu1 }
 0x275   : > { %v3862_v29 = vpop.f32.mrb[31].mxu1 }
 0x276   : > { %v2815_v3 = vadd.f32 %v3860_v21, %v2750_v6  ;;  %v3863_v35 = vadd.f32 %v3862_v29, %v3861_v28 }
 0x278   : > { %v2818_v4 = vadd.f32 %v3863_v35, %v2753_v8 }
 0x27a   : > { %v3880_v31 = vpop.f32.mrb[32].mxu1 }
 0x27b   : > { %v3881_v46 = vpop.f32.mrb[33].mxu1 }
 0x27c   : > { %v3882_v9 = vadd.f32 %v3881_v46, %v3880_v31  ;;  %v3883_v42 = vpop.f32.mrb[34].mxu1 }
 0x27d   : > { %v3884_v18 = vpop.f32.mrb[35].mxu1 }
 0x27e   : > { %v2856_v7 = vadd.f32 %v3882_v9, %v2791_v56  ;;  %v3885_v17 = vadd.f32 %v3884_v18, %v3883_v42 }
 0x280   : > { %v2859_v45 = vadd.f32 %v3885_v17, %v2794_v39  ;;  %v2921_v47 = vadd.f32 %v4765_v53, %v2856_v7  ;;  %v4188_v7 = vld [vmem:[%s4948_s7 + $0x10] ss:$8 sps:$4 sm:$0xff]  }
 0x282   : > { %v3886_v30 = vpop.f32.mrb[36].mxu1  ;;  %v2924_v36 = vadd.f32 %v4767_v58, %v2859_v45  ;;  %v4193_v45 = vld [vmem:[%s4948_s7 + $0x24] ss:$8 sps:$4 sm:$0xff]  }
 0x283   : > { %v3887_v16 = vpop.f32.mrb[37].mxu1 }
 0x284   : > { %v3888_v0 = vadd.f32 %v3887_v16, %v3886_v30  ;;  %v3889_v23 = vpop.f32.mrb[38].mxu1 }
 0x285   : > { %v3890_v10 = vpop.f32.mrb[39].mxu1 }
 0x286   : > { %v2864_v25 = vadd.f32 %v3888_v0, %v2799_v59  ;;  %v3891_v20 = vadd.f32 %v3890_v10, %v3889_v23  ;;  %v4191_v23 = vld [vmem:[%s4948_s7 + $0x20] ss:$8 sps:$4 sm:$0xff]  }
 0x288   : > { %v2867_v43 = vadd.f32 %v3891_v20, %v2802_v60  ;;  %v2929_v37 = vadd.f32 %v4769_v63, %v2864_v25  ;;  %v4196_v25 = vld [vmem:[%s4948_s7 + $0x34] ss:$8 sps:$4 sm:$0xff]   ;;  %v4194_v20 = vld [vmem:[%s4948_s7 + $0x30] ss:$8 sps:$4 sm:$0xff]  }
 0x28a   : > { %v3892_v50 = vpop.f32.mrb[40].mxu1  ;;  %v2932_v51 = vadd.f32 %v4771_v41, %v2867_v43  ;;  %v3048_v43 = vsub.s32 0, %v4487_v34 }
 0x28b   : > { %v3893_v56 = vpop.f32.mrb[41].mxu1 }
 0x28c   : > { %v3894_v40 = vadd.f32 %v3893_v56, %v3892_v50  ;;  %v3895_v39 = vpop.f32.mrb[42].mxu1 }
 0x28d   : > { %v3896_v38 = vpop.f32.mrb[43].mxu1 }
 0x28e   : > { %v2872_v53 = vadd.f32 %v3894_v40, %v2807_v57  ;;  %v3897_v54 = vadd.f32 %v3896_v38, %v3895_v39 }
 0x290   : > { %v2875_v27 = vadd.f32 %v3897_v54, %v2810_v13  ;;  %v2937_v58 = vadd.f32 %v4773_v24, %v2872_v53 }
 0x292   : > { %v3898_v61 = vpop.f32.mrb[44].mxu1  ;;  %v2940_v62 = vadd.f32 %v4775_v32, %v2875_v27 }
 0x293   : > { %v3899_v59 = vpop.f32.mrb[45].mxu1 }
 0x294   : > { %v3900_v49 = vadd.f32 %v3899_v59, %v3898_v61  ;;  %v3901_v60 = vpop.f32.mrb[46].mxu1 }
 0x295   : > { %v3902_v26 = vpop.f32.mrb[47].mxu1 }
 0x296   : > { %v2880_v63 = vadd.f32 %v3900_v49, %v2815_v3  ;;  %v3903_v55 = vadd.f32 %v3902_v26, %v3901_v60  ;;  %v4185_v3 = vld [vmem:[%s4948_s7] ss:$8 sps:$4 sm:$0xff]  }
 0x298   : > { %v2883_v1 = vadd.f32 %v3903_v55, %v2818_v4  ;;  %v2945_v41 = vadd.f32 %v4777_v44, %v2880_v63 }
 0x29a   : > { %v3990_v2 = vpop.f32.mrb[48].mxu1  ;;  %v2948_v52 = vadd.f32 %v4779_v48, %v2883_v1  ;;  %v4190_v48 = vld [vmem:[%s4948_s7 + $0x14] ss:$8 sps:$4 sm:$0xff]  }
 0x29b   : > { %v2994_v57 = vadd.f32 %v3990_v2, %v2929_v37  ;;  %v2985_v33 = vpop.f32.mrb[49].mxu1  ;;  %v3052_v37 = vsub.s32 1, %v4487_v34 }
 0x29c   : > { %v2986_v13 = vadd.f32 %v2985_v33, %v2921_v47  ;;  %v3991_v14 = vpop.f32.mrb[50].mxu1 }
 0x29d   : > { %v2997_v24 = vadd.f32 %v3991_v14, %v2932_v51  ;;  %v2988_v19 = vpop.f32.mrb[51].mxu1  ;;  %v3018_v32 = vmax.f32 %v2994_v57, 0.0 }
 0x29e   : > { %v2989_v6 = vadd.f32 %v2988_v19, %v2924_v36  ;;  %v3016_v28 = vmax.f32 %v2986_v13, 0.0 }
 0x29f   : > { %v3019_v21 = vmax.f32 %v2997_v24, 0.0 }
 0x2a0   : > { %v3017_v29 = vmax.f32 %v2989_v6, 0.0 }
 0x2a1   : > { %v3025_v8 = vpack.c.bf16 %v3019_v21, %v3018_v32 }
 0x2a2   : > { %v3024_v44 = vpack.c.bf16 %v3017_v29, %v3016_v28  ;;  %v3994_v35 = vpop.f32.mrb[52].mxu1 }
 0x2a3   : > { %v3010_v4 = vadd.f32 %v3994_v35, %v2945_v41  ;;  %v3001_v31 = vpop.f32.mrb[53].mxu1 }
 0x2a4   : > { %v3002_v46 = vadd.f32 %v3001_v31, %v2937_v58  ;;  %v3995_v9 = vpop.f32.mrb[54].mxu1  ;;  %3169 = vmatmul.mubr.bf16.vlgmr.msra.gmra.mrb[24].mxu0 %v3024_v44 }
 0x2a5   : > { %v3013_v42 = vadd.f32 %v3995_v9, %v2948_v52  ;;  %3258 = vmatpush1.bf16.msra.mxu0 %v4185_v3  ;;  %v3004_v18 = vpop.f32.mrb[55].mxu1  ;;  %3178 = vmatprep.mubr.bf16.mxu0 %v4296_v22  ;;  %v3022_v47 = vmax.f32 %v3010_v4, 0.0 }
 0x2a6   : > { %v3005_v17 = vadd.f32 %v3004_v18, %v2940_v62  ;;  %3259 = vmatprep.subr.bf16.mxu0 %v4190_v48  ;;  %v3020_v36 = vmax.f32 %v3002_v46, 0.0 }
 0x2a7   : > { %v3023_v30 = vmax.f32 %v3013_v42, 0.0 }
 0x2a8   : > { %v3021_v16 = vmax.f32 %v3005_v17, 0.0 }
 0x2a9   : > { %v3027_v0 = vpack.c.bf16 %v3023_v30, %v3022_v47  ;;  %3260 = vmatpush1.bf16.msra.mxu0 %v4188_v7 }
 0x2aa   : > { %v3026_v10 = vpack.c.bf16 %v3021_v16, %v3020_v36  ;;  %3261 = vmatprep.subr.bf16.mxu0 %v4193_v45 }
 0x2ac   : > { %3179 = vmatmul.mubr.bf16.gmra.mrb[28].mxu0 %v3025_v8 }
 0x2ad   : > { %3188 = vmatprep.mubr.bf16.mxu0 %v4296_v22  ;;  %3262 = vmatpush1.bf16.msra.mxu0 %v4191_v23 }
 0x2ae   : > { %3263 = vmatprep.subr.bf16.mxu0 %v4196_v25 }
 0x2b1   : > { %3264 = vmatpush1.bf16.msra.mxu0 %v4194_v20 }
 0x2b4   : > { %3189 = vmatmul.mubr.bf16.gmra.mrb[32].mxu0 %v3026_v10 }
 0x2b5   : > { %3198 = vmatprep.mubr.bf16.mxu0 %v4296_v22 }
 0x2bc   : > { %3199 = vmatmul.mubr.bf16.gmra.mrb[36].mxu0 %v3027_v0 }
 0x2bd   : > { %3289 = vmatprep.mubr.bf16.mxu0 %v4296_v22 }
 0x2c4   : > { %3749 = vmatmul.mubr.msk.bf16.vlgmr.msra.gmra.mrb[24].mxu0 %vm398_vm0, %v4449_v5  ;;  %v3044_v5 = vld [vmem:[%s4947_s6] sm:$0x3] }
 0x2c5   : > { %3299 = vmatprep.mubr.bf16.mxu0 %v4296_v22  ;;  %v4836_v50 = vrot.slane %v3044_v5, %v3048_v43 }
 0x2cc   : > { %3750 = vmatmul.mubr.msk.bf16.gmra.mrb[28].mxu0 %vm398_vm0, %v4456_v11  ;;  %v3346_v11 = vld [vmem:[%s4949_s8] sm:$0x3] }
 0x2cd   : > { %3309 = vmatprep.mubr.bf16.mxu0 %v4296_v22  ;;  %v4842_v51 = vrot.slane %v3346_v11, %v3052_v37 }
 0x2d4   : > { %3751 = vmatmul.mubr.msk.bf16.gmra.mrb[32].mxu0 %vm398_vm0, %v4458_v12  ;;  %v4838_v12 = vrot.slane %v3044_v5, %v3052_v37 }
 0x2d5   : > { %3319 = vmatprep.mubr.bf16.mxu0 %v4296_v22  ;;  %v4840_v22 = vrot.slane %v3346_v11, %v3048_v43 }
 0x2dc   : > { %3752 = vmatmul.mubr.msk.bf16.gmra.mrb[36].mxu0 %vm398_vm0, %v4464_v15 }
 0x397   : > { %v3291_v15 = vpop.f32.mrb[24].mxu0 }
 0x398   : > { %v3996_v56 = vadd.f32 %v3291_v15, %v4836_v50  ;;  %v3293_v40 = vpop.f32.mrb[25].mxu0 }
 0x399   : > { %v3997_v39 = vadd.f32 %v3293_v40, %v4838_v12  ;;  %v3295_v34 = vpop.f32.mrb[26].mxu0 }
 0x39a   : > { %v3358_v38 = vadd.f32 %v3996_v56, %v4840_v22  ;;  %v3998_v53 = vadd.f32 %v3295_v34, %v4836_v50  ;;  %v3297_v54 = vpop.f32.mrb[27].mxu0 }
 0x39b   : > { %v3359_v27 = vadd.f32 %v3997_v39, %v4842_v51  ;;  %v3999_v58 = vadd.f32 %v3297_v54, %v4838_v12 }
 0x39c   : > { %v3374_v61 = vmax.f32 %v3358_v38, 0.0  ;;  %v3360_v62 = vadd.f32 %v3998_v53, %v4840_v22 }
 0x39d   : > { %v3375_v59 = vmax.f32 %v3359_v27, 0.0  ;;  %v3361_v49 = vadd.f32 %v3999_v58, %v4842_v51 }
 0x39e   : > { %v3376_v60 = vmax.f32 %v3360_v62, 0.0 }
 0x39f   : > { %v3767_v26 = vpack.c.bf16 %v3375_v59, %v3374_v61  ;;  %v3377_v63 = vmax.f32 %v3361_v49, 0.0  ;;  %v3301_v55 = vpop.f32.mrb[28].mxu0 }
 0x3a0   : > { %v4000_v1 = vadd.f32 %v3301_v55, %v4836_v50  ;;  %v3303_v41 = vpop.f32.mrb[29].mxu0 }
 0x3a1   : > { %3454 = vst [vmem:[%s4856_s28] sm:$0xff] %v3767_v26  ;;  %v3768_v2 = vpack.c.bf16 %v3377_v63, %v3376_v60  ;;  %v4001_v52 = vadd.f32 %v3303_v41, %v4838_v12  ;;  %v3305_v57 = vpop.f32.mrb[30].mxu0 }
 0x3a2   : > { %v3362_v33 = vadd.f32 %v4000_v1, %v4840_v22  ;;  %v4002_v13 = vadd.f32 %v3305_v57, %v4836_v50  ;;  %v3307_v14 = vpop.f32.mrb[31].mxu0 }
 0x3a3   : > { %3455 = vst [vmem:[%s4856_s28 + $0x8] sm:$0xff] %v3768_v2  ;;  %v3363_v24 = vadd.f32 %v4001_v52, %v4842_v51  ;;  %v4003_v19 = vadd.f32 %v3307_v14, %v4838_v12 }
 0x3a4   : > { %v3378_v6 = vmax.f32 %v3362_v33, 0.0  ;;  %v3364_v32 = vadd.f32 %v4002_v13, %v4840_v22 }
 0x3a5   : > { %v3379_v21 = vmax.f32 %v3363_v24, 0.0  ;;  %v3365_v28 = vadd.f32 %v4003_v19, %v4842_v51 }
 0x3a6   : > { %v3380_v29 = vmax.f32 %v3364_v32, 0.0 }
 0x3a7   : > { %v3769_v8 = vpack.c.bf16 %v3379_v21, %v3378_v6  ;;  %v3381_v3 = vmax.f32 %v3365_v28, 0.0  ;;  %v3311_v44 = vpop.f32.mrb[32].mxu0 }
 0x3a8   : > { %v4004_v35 = vadd.f32 %v3311_v44, %v4836_v50  ;;  %v3313_v48 = vpop.f32.mrb[33].mxu0 }
 0x3a9   : > { %3456 = vst [vmem:[%s4856_s28 + $0x10] sm:$0xff] %v3769_v8  ;;  %v3770_v4 = vpack.c.bf16 %v3381_v3, %v3380_v29  ;;  %v4005_v31 = vadd.f32 %v3313_v48, %v4838_v12  ;;  %v3315_v46 = vpop.f32.mrb[34].mxu0 }
 0x3aa   : > { %v3366_v9 = vadd.f32 %v4004_v35, %v4840_v22  ;;  %v4006_v42 = vadd.f32 %v3315_v46, %v4836_v50  ;;  %v3317_v18 = vpop.f32.mrb[35].mxu0 }
 0x3ab   : > { %3457 = vst [vmem:[%s4856_s28 + $0x18] sm:$0xff] %v3770_v4  ;;  %v3367_v7 = vadd.f32 %v4005_v31, %v4842_v51  ;;  %v4007_v17 = vadd.f32 %v3317_v18, %v4838_v12 }
 0x3ac   : > { %v3382_v45 = vmax.f32 %v3366_v9, 0.0  ;;  %v3368_v47 = vadd.f32 %v4006_v42, %v4840_v22 }
 0x3ad   : > { %v3383_v30 = vmax.f32 %v3367_v7, 0.0  ;;  %v3369_v36 = vadd.f32 %v4007_v17, %v4842_v51 }
 0x3ae   : > { %v3384_v16 = vmax.f32 %v3368_v47, 0.0 }
 0x3af   : > { %v3771_v0 = vpack.c.bf16 %v3383_v30, %v3382_v45  ;;  %v3385_v23 = vmax.f32 %v3369_v36, 0.0  ;;  %v3321_v10 = vpop.f32.mrb[36].mxu0 }
 0x3b0   : > { %v4008_v25 = vadd.f32 %v3321_v10, %v4836_v50  ;;  %v3323_v20 = vpop.f32.mrb[37].mxu0 }
 0x3b1   : > { %3458 = vst [vmem:[%s4856_s28 + $0x20] sm:$0xff] %v3771_v0  ;;  %v3772_v43 = vpack.c.bf16 %v3385_v23, %v3384_v16  ;;  %v4009_v5 = vadd.f32 %v3323_v20, %v4838_v12  ;;  %v3325_v37 = vpop.f32.mrb[38].mxu0 }
 0x3b2   : > { %v3370_v11 = vadd.f32 %v4008_v25, %v4840_v22  ;;  %v4010_v15 = vadd.f32 %v3325_v37, %v4836_v50  ;;  %v3327_v56 = vpop.f32.mrb[39].mxu0 }
 0x3b3   : > { %3459 = vst [vmem:[%s4856_s28 + $0x28] sm:$0xff] %v3772_v43  ;;  %v3371_v40 = vadd.f32 %v4009_v5, %v4842_v51  ;;  %v4011_v39 = vadd.f32 %v3327_v56, %v4838_v12 }
 0x3b4   : > { %v3386_v34 = vmax.f32 %v3370_v11, 0.0  ;;  %v3372_v38 = vadd.f32 %v4010_v15, %v4840_v22 }
 0x3b5   : > { %v3387_v53 = vmax.f32 %v3371_v40, 0.0  ;;  %v3373_v54 = vadd.f32 %v4011_v39, %v4842_v51 }
 0x3b6   : > { %v3388_v27 = vmax.f32 %v3372_v38, 0.0 }
 0x3b7   : > { %v3773_v50 = vpack.c.bf16 %v3387_v53, %v3386_v34  ;;  %v3389_v58 = vmax.f32 %v3373_v54, 0.0 }
 0x3b9   : > { %3460 = vst [vmem:[%s4856_s28 + $0x30] sm:$0xff] %v3773_v50  ;;  %v3774_v12 = vpack.c.bf16 %v3389_v58, %v3388_v27 }
 0x3bb   : > { %3461 = vst [vmem:[%s4856_s28 + $0x38] sm:$0xff] %v3774_v12 }
 0x3bc   : > { %4238 = shalt.err (!%p4235_p7)
}
 0x3bd   : > { %s4239_s25 = scalar_lea.hbm %s4892_s16, 1024  ;;  %s4243_s27 = scalar_lea.hbm %s4950_s9, 2048 }
 0x3be   : > { %p4240_p8 = scmp.ne.s32.totalorder %s4892_s16, %s4239_s25  ;;  %p4244_p1 = scmp.lt.u32.totalorder %s4892_s16, %s4950_s9 }
 0x3bf   : > { %p4245_p0 = scmp.lt.u32.totalorder %s4243_s27, %s4239_s25  ;;  %p4247_p6 = scmp.lt.u32.totalorder %s4239_s25, %s4892_s16 }
 0x3c0   : > { %p4241_p11 = pnand %p4240_p8, %p4961_p9 }
 0x3c1   : > { %p4246_p5 = por %p4245_p0, %p4244_p1 }
 0x3c2   : > { %p4242_p13 = pneg %p4241_p11 }
 0x3c3   : > { %p4248_p10 = por %p4247_p6, %p4246_p5 }
 0x3c5   : > { %p4249_p12 = pnand %p4248_p10, %p4242_p13 }
 0x3c7   : > { %4252 = shalt.err (!%p4249_p12)
}
 0x3c8   : > { %s4300_s13 = smov 128   ;;  %s4301_s21 = smov 8  }
 0x3c9   : > { %4032 = dma.vmem_to_hbm [thread:$0]  (%p4961_p9), %s4894_s29, 1024, %s4892_s16, %s4900_s23, %s4300_s13, %s4300_s13, %s4301_s21  }
 0x3ca PF: > { %p4044_p2 = scmp.ge.s32.totalorder %s4291_s12, 2  ;;  %s3491_s17 = sand.u32 1, %s4279_s30  }
 0x3cb   : > { %p4962_p3 = scmp.ne.s32.totalorder %s4955_s20, 0  ;;  %s3492_s22 = scalar_lea.sflag [#allocation6], %s3491_s17 }
 0x3cd   : > { %p4039_p4 = pnand %p4044_p2, %p4962_p3 }
 0x3cf   : > { %4274 = dma.done.wait (!%p4039_p4), %s3492_s22, 1024  }
 0x3d0   : > { %4276 = vsyncadd (!%p4039_p4), %s3492_s22, 4294966272  ;;  %p20_p7 = scmp.ge.s32.totalorder %s4377_s15, 4   ;;  %s4963_s30 = smov %s4283_s10 }
 0x3d1   : > { %s4964_s10 = smov %s4287_s11  ;;  %s4965_s11 = smov %s4388_s18 }
 0x3d2   : > { %s4966_s12 = smov %s4377_s15  ;;  %22 = sbr.rel (!%p20_p7) target bundleno = 4 (0x4), region = 96 }
 0x3d9   :  { %3497 = vsyncpa [#allocation5], 1 }
 0x3da   :  { %3499 = vsyncpa [#allocation5 + $0x1], 1 }
 0x3db   :  { %3500 = vsyncpa [#allocation6], 1 }
 0x3dc   :  { %3502 = vsyncpa [#allocation6 + $0x1], 1 }

</bundles_post_ra>
